<compile_context>
chip_gen: v6e
topology: v6e:2x2x1
jax: 0.10.0
libtpu: 0.0.40
codegen_flags: <defaults>
</compile_context>

<pallas_src>
import numpy as np
import jax
import jax.numpy as jnp
from jax import lax
from jax.experimental import pallas as pl
from jax.experimental.pallas import tpu as pltpu

# ---------------- small synthetic config ----------------
B, S, H, V = 16, 64, 128, 1024         # batch, seq, hidden, vocab (toy sizes)
NUM_SEP = 4                            # sep_indices per query -> P = 3 passages
P = NUM_SEP - 1
LN_EPS = 1e-12
SPECIAL_TOKEN_IDS = [i for i in range(999) if i != 100]   # as in SparseMlmDqr.__init__
NORM_POWER = 2                         # model_args.norm_power (F.normalize default)
NO_RELU = False                        # model_args.no_relu
LOG_SAT = False                        # model_args.log_sat

# ---- tile knobs (at production BERT sizes: TM~512-1024, TV=512 on v7x /
#      1024-2048 on v5e/v6e, BT a multiple of 8 or == B) ----
TM = 256                               # token tile for Kernel A
TV = 512                               # vocab tile for Kernel B
BT = 8                                 # batch tile for Kernel B (whole sequences per step)
assert (B * S) % TM == 0 and V % TV == 0 and B % BT == 0
assert BT % 8 == 0 or BT == B          # out-block sublane constraint

# TODO(synk): optional decoder-weight quantization (int8 on v5e/v6e, fp8 on v7x
# with per-column scales folded into the post-pool epilogue) not implemented.


def _pick_vmem_limit():
    """~100 MiB on 128-MiB-VMEM parts (v5e/v6e), 32 MiB on 64-MiB parts (v7x)."""
    cap = 64 << 20
    try:
        cap = int(pltpu.get_tpu_info().vmem_capacity_bytes)
    except Exception:
        pass
    return (100 << 20) if cap >= (128 << 20) else (32 << 20)


VMEM_LIMIT = _pick_vmem_limit()

# keep-mask for "sparse_vector[:, special_ids] = 0.0": built once, not per forward
_keep_np = np.ones((1, V), np.float32)
_keep_np[0, np.array([i for i in SPECIAL_TOKEN_IDS if i < V], dtype=np.int64)] = 0.0
KEEP_MASK = jnp.asarray(_keep_np)


# ---------------- shared math ----------------
def _gelu(x):
    # TODO(synk): HF BertPredictionHeadTransform default 'gelu' is the exact erf
    # form; tanh approximation used for a guaranteed TPU/EUP lowering.
    return 0.5 * x * (1.0 + jnp.tanh(0.7978845608028654 * (x + 0.044715 * x * x * x)))


def _layernorm(x, gamma, beta):
    mu = jnp.mean(x, axis=-1, keepdims=True)
    var = jnp.mean((x - mu) ** 2, axis=-1, keepdims=True)
    return (x - mu) * lax.rsqrt(var + LN_EPS) * gamma + beta


# ---------------- Buffered(1) capability probe ----------------
def _single_buffer_supported():
    try:
        def k(x_ref, o_ref):
            o_ref[...] = x_ref[...] * 2.0
        f = pl.pallas_call(
            k,
            out_shape=jax.ShapeDtypeStruct((8, 128), jnp.float32),
            grid=(2,),
            in_specs=[pl.BlockSpec((8, 128), lambda i: (0, 0),
                                   pipeline_mode=pl.Buffered(1))],
            out_specs=pl.BlockSpec((8, 128), lambda i: (0, 0)),
        )
        jax.block_until_ready(f(jnp.ones((8, 128), jnp.float32)))
        return True
    except Exception:
        return False


_SINGLE_BUFFER_OK = _single_buffer_supported()


def _invariant_kwargs():
    """Single-buffer grid-invariant blocks (no refetch to hide) when supported."""
    return {"pipeline_mode": pl.Buffered(1)} if _SINGLE_BUFFER_OK else {}


# =====================================================================
# Kernel A: BertPredictionHeadTransform of every token (dense->gelu->LN),
# tiled over the token axis, bf16 output for the decoder MXU.
# =====================================================================
def transform_kernel(h_ref, wt_ref, bt_ref, g_ref, be_ref, t_ref):
    x = jnp.dot(h_ref[...].astype(jnp.bfloat16), wt_ref[...],
                preferred_element_type=jnp.float32) + bt_ref[...]
    x = _gelu(x)                                   # elementwise kept in f32 (v5e-friendly)
    x = _layernorm(x, g_ref[...], be_ref[...])
    t_ref[...] = x.astype(jnp.bfloat16)


def cls_transform_pallas(hidden2d, wt_bf16, bt, g, be):
    n_rows = hidden2d.shape[0]
    inv = _invariant_kwargs()
    return pl.pallas_call(
        transform_kernel,
        out_shape=jax.ShapeDtypeStruct((n_rows, H), jnp.bfloat16),
        grid=(n_rows // TM,),
        in_specs=[
            pl.BlockSpec((TM, H), lambda i: (i, 0)),            # hidden streams
            pl.BlockSpec((H, H), lambda i: (0, 0), **inv),       # wt  (invariant)
            pl.BlockSpec((1, H), lambda i: (0, 0), **inv),       # bt
            pl.BlockSpec((1, H), lambda i: (0, 0), **inv),       # gamma
            pl.BlockSpec((1, H), lambda i: (0, 0), **inv),       # beta
        ],
        out_specs=pl.BlockSpec((TM, H), lambda i: (i, 0)),
        compiler_params=pltpu.CompilerParams(
            dimension_semantics=("parallel",),
            vmem_limit_bytes=VMEM_LIMIT),
    )(hidden2d, wt_bf16, bt, g, be)


# =====================================================================
# Kernel B: vocab decoder + attention-masked max-pool + special-token zero
#           + ReLU epilogue.  grid=(V//TV, B//BT): vocab "parallel",
#           batch-tile "arbitrary".  Each step holds BT whole sequences.
# =====================================================================
def decoder_kernel(t_ref, bias_ref, floor_ref, wd_ref, bd_ref, keep_ref, out_ref):
    # bf16 x bf16 MXU matmul, f32 accumulation
    scores = jnp.dot(t_ref[...], wd_ref[...],
                     preferred_element_type=jnp.float32)          # (BT*S, TV)
    # additive row mask bias: 0 (kept) or -1e30 (masked); broadcasts along lanes
    scores = scores + bias_ref[...]
    pooled = jnp.max(scores.reshape(BT, S, TV), axis=1)           # (BT, TV)
    # decoder bias added post-pool (column-constant => identical to pre-pool add)
    pooled = pooled + bd_ref[...]
    # exact torch masked_fill(-100) semantics: floor is -100 only for rows that
    # actually contain masked positions, else -3e38 (no clamp)
    pooled = jnp.maximum(pooled, floor_ref[...])
    # fused finalize epilogue: zero special tokens, ReLU, (optional log-sat)
    pooled = pooled * keep_ref[...]
    if not NO_RELU:
        pooled = jnp.maximum(pooled, 0.0)
    if LOG_SAT:
        pooled = jnp.log1p(pooled)
    out_ref[...] = pooled


def mlm_head_pooled(t_bf16, mask_bias, row_floor, wd_bf16, bd, keep_mask):
    return pl.pallas_call(
        decoder_kernel,
        out_shape=jax.ShapeDtypeStruct((B, V), jnp.float32),
        grid=(V // TV, B // BT),
        in_specs=[
            pl.BlockSpec((BT * S, H), lambda j, m: (m, 0)),   # t streams along batch tiles
            pl.BlockSpec((BT * S, 1), lambda j, m: (m, 0)),   # additive mask bias
            pl.BlockSpec((BT, 1),     lambda j, m: (m, 0)),   # per-row -100 floor
            pl.BlockSpec((H, TV),     lambda j, m: (0, j)),   # decoder weight tile
            pl.BlockSpec((1, TV),     lambda j, m: (0, j)),   # decoder bias tile
            pl.BlockSpec((1, TV),     lambda j, m: (0, j)),   # special-token keep mask
        ],
        out_specs=pl.BlockSpec((BT, TV), lambda j, m: (m, j)),
        compiler_params=pltpu.CompilerParams(
            dimension_semantics=("parallel", "arbitrary"),
            vmem_limit_bytes=VMEM_LIMIT),
    )(t_bf16, mask_bias, row_floor, wd_bf16, bd, keep_mask)


# =====================================================================
# Plain-JAX glue
# =====================================================================
def l2_normalize(x, p=NORM_POWER, eps=1e-12):
    if p == 2:
        nrm = jnp.sqrt(jnp.sum(x * x, axis=1, keepdims=True))
    else:
        nrm = jnp.sum(jnp.abs(x) ** p, axis=1, keepdims=True) ** (1.0 / p)
    return x / jnp.maximum(nrm, eps)


def score_psgs_jax(hidden, sep_indices, psg_params, rr_params):
    """score_psgs: masked per-passage mean pool + psg_transform + reranker.
    Only B*P*H work -> plain JAX per perf review (keeps Kernel A a clean pipeline)."""
    pwt, pbt, pg, pbe = psg_params
    wr, br = rr_params
    pos = jnp.arange(S)[None, None, :]                      # (1, 1, S)
    lo = sep_indices[:, :-1, None]                          # (B, P, 1)
    hi = sep_indices[:, 1:, None]                           # (B, P, 1)
    seg = (pos > lo) & (pos < hi)                           # tokens sep+1 .. next_sep-1
    nonempty = sep_indices[:, 1:] > sep_indices[:, :-1] + 1               # (B, P)
    valid = jnp.cumprod(nonempty.astype(jnp.int32), axis=1).astype(bool)  # "break"
    seg = (seg & valid[:, :, None]).astype(jnp.float32)
    cnt = jnp.maximum(jnp.sum(seg, axis=-1, keepdims=True), 1.0)
    pv = jnp.einsum('bps,bsh->bph', seg, hidden) / cnt       # (B, P, H) mean pools
    y = pv @ pwt + pbt                                       # psg_transform
    y = _gelu(y)
    y = _layernorm(y, pg, pbe)
    logits = jnp.squeeze(y @ wr.T, -1) + br                  # reranker -> (B, P)
    return jnp.where(valid, logits, jnp.nan)


# =====================================================================
# Minimal plain-JAX BERT-encoder stand-in (deterministic weights)
# =====================================================================
def _ln_jax(x, g, b):
    mu = jnp.mean(x, axis=-1, keepdims=True)
    var = jnp.mean((x - mu) ** 2, axis=-1, keepdims=True)
    return (x - mu) * lax.rsqrt(var + LN_EPS) * g + b


def bert_encoder(p, input_ids, attention_mask, token_type_ids):
    x = p['tok_emb'][input_ids] + p['pos_emb'][None, :, :] + p['type_emb'][token_type_ids]
    x = _ln_jax(x, p['emb_ln_g'], p['emb_ln_b'])
    nh, hd = 4, H // 4
    q = (x @ p['wq']).reshape(B, S, nh, hd).transpose(0, 2, 1, 3)
    k = (x @ p['wk']).reshape(B, S, nh, hd).transpose(0, 2, 1, 3)
    v = (x @ p['wv']).reshape(B, S, nh, hd).transpose(0, 2, 1, 3)
    bias = (1.0 - attention_mask[:, None, None, :].astype(jnp.float32)) * -1e9
    att = jax.nn.softmax(q @ k.transpose(0, 1, 3, 2) / jnp.sqrt(float(hd)) + bias, axis=-1)
    ctx = (att @ v).transpose(0, 2, 1, 3).reshape(B, S, H)
    x = _ln_jax(x + ctx @ p['wo'], p['attn_ln_g'], p['attn_ln_b'])
    ff = _gelu(x @ p['w1'] + p['b1'])
    x = _ln_jax(x + ff @ p['w2'] + p['b2'], p['ffn_ln_g'], p['ffn_ln_b'])
    return x


# ---------------- deterministic parameter init ----------------
def _normal(key, shape, scale=0.02):
    return scale * jax.random.normal(key, shape, dtype=jnp.float32)


def init_params(key):
    ks = iter(jax.random.split(key, 16))
    enc = dict(
        tok_emb=_normal(next(ks), (V, H)),
        pos_emb=_normal(next(ks), (S, H)),
        type_emb=_normal(next(ks), (2, H)),
        emb_ln_g=jnp.ones((H,), jnp.float32), emb_ln_b=jnp.zeros((H,), jnp.float32),
        wq=_normal(next(ks), (H, H)), wk=_normal(next(ks), (H, H)),
        wv=_normal(next(ks), (H, H)), wo=_normal(next(ks), (H, H)),
        attn_ln_g=jnp.ones((H,), jnp.float32), attn_ln_b=jnp.zeros((H,), jnp.float32),
        w1=_normal(next(ks), (H, 4 * H)), b1=jnp.zeros((4 * H,), jnp.float32),
        w2=_normal(next(ks), (4 * H, H)), b2=jnp.zeros((H,), jnp.float32),
        ffn_ln_g=jnp.ones((H,), jnp.float32), ffn_ln_b=jnp.zeros((H,), jnp.float32),
    )
    # encoder.cls (BertLMPredictionHead): transform + vocab decoder.
    # MXU-facing weights (wt, wd) stored in bf16 ONCE at init (perf feedback #1).
    cls = (
        _normal(next(ks), (H, H)).astype(jnp.bfloat16),       # wt  (bf16)
        jnp.zeros((1, H), jnp.float32),                       # bt
        jnp.ones((1, H), jnp.float32), jnp.zeros((1, H), jnp.float32),   # LN gamma/beta
        _normal(next(ks), (H, V)).astype(jnp.bfloat16),       # wd  (bf16)
        jnp.zeros((1, V), jnp.float32),                       # bd
    )
    # self.psg_transform (separate BertPredictionHeadTransform instance) — f32, JAX path
    psg = (
        _normal(next(ks), (H, H)), jnp.zeros((1, H), jnp.float32),
        jnp.ones((1, H), jnp.float32), jnp.zeros((1, H), jnp.float32),
    )
    # self.reranker = nn.Linear(H, 1)
    rr = (_normal(next(ks), (1, H)), jnp.zeros((1,), jnp.float32))
    return dict(encoder=enc, cls=cls, psg_transform=psg, reranker=rr)


# ---------------- full forward (== SparseMlmDqr.forward) ----------------
def sparse_mlm_dqr_forward(params, batch, scoring=True):
    hidden = bert_encoder(params['encoder'], batch['input_ids'],
                          batch['attention_mask'], batch['token_type_ids'])

    psgs_logit = (score_psgs_jax(hidden, batch['sep_indices'],
                                 params['psg_transform'], params['reranker'])
                  if scoring else None)

    wt, bt, g, be, wd, bd = params['cls']     # wt, wd already bf16 (no per-call cast)

    # Kernel A: token transform, hidden fed 2-D and streamed over token tiles
    t_bf16 = cls_transform_pallas(hidden.reshape(B * S, H), wt, bt, g, be)

    # Kernel B prep: additive row mask bias + per-row -100 floor (exact torch
    # masked_fill(-100) + max(dim=1) semantics, incl. fully-masked rows / NO_RELU)
    am = batch['attention_mask'].astype(jnp.float32)                    # (B, S)
    mask_bias = ((am - 1.0) * 1e30).reshape(B * S, 1)                   # 0 / -1e30
    row_floor = jnp.where(jnp.any(am < 0.5, axis=1, keepdims=True),
                          jnp.float32(-100.0), jnp.float32(-3.0e38))    # (B, 1)

    pooled = mlm_head_pooled(t_bf16, mask_bias, row_floor, wd, bd, KEEP_MASK)

    # L2 normalization of a (B, V) array is trivial -> plain JAX
    sparse_vector = l2_normalize(pooled)
    return sparse_vector, psgs_logit


if __name__ == "__main__":
    key = jax.random.PRNGKey(0)
    pkey, ikey = jax.random.split(key)
    params = init_params(pkey)

    input_ids = jax.random.randint(ikey, (B, S), 0, V, dtype=jnp.int32)
    # two attention-mask patterns, tiled over the batch
    mask_full = jnp.ones((1, S), jnp.int32)
    mask_part = jnp.concatenate([jnp.ones((1, 48), jnp.int32),
                                 jnp.zeros((1, S - 48), jnp.int32)], axis=1)
    attention_mask = jnp.tile(jnp.concatenate([mask_full, mask_part], axis=0), (B // 2, 1))
    token_type_ids = jnp.zeros((B, S), jnp.int32)
    # even rows: 3 non-empty passages; odd rows: empty 2nd passage -> "break" -> NaNs
    sep_indices = jnp.tile(jnp.array([[5, 15, 25, 40],
                                      [4, 10, 11, 30]], dtype=jnp.int32), (B // 2, 1))

    batch = dict(input_ids=input_ids, attention_mask=attention_mask,
                 token_type_ids=token_type_ids, sep_indices=sep_indices)

    sparse_vector, psgs_logit = sparse_mlm_dqr_forward(params, batch, scoring=True)
    sparse_vector = jax.block_until_ready(sparse_vector)
    psgs_logit = jax.block_until_ready(psgs_logit)

    assert sparse_vector.shape == (B, V)
    assert psgs_logit.shape == (B, P)
    assert bool(jnp.all(jnp.isfinite(sparse_vector)))
    assert bool(jnp.all(sparse_vector >= 0.0))                         # post-ReLU
    special_in_vocab = jnp.asarray([i for i in SPECIAL_TOKEN_IDS if i < V], dtype=jnp.int32)
    assert float(jnp.max(jnp.abs(sparse_vector[:, special_in_vocab]))) == 0.0
    assert not bool(jnp.isnan(psgs_logit[0, 0]))                        # valid passage
    assert bool(jnp.isnan(psgs_logit[1, 1])) and bool(jnp.isnan(psgs_logit[1, 2]))  # "break"
    print("KERNEL_OK")
</pallas_src>

<mosaic_0001>
module attributes {stable_mosaic.version = 11 : i64} {
  func.func @k(%arg0: i32, %arg1: memref<8x128xf32, #tpu.memory_space<vmem>>, %arg2: memref<8x128xf32, #tpu.memory_space<vmem>>) attributes {dimension_semantics = [#tpu.dimension_semantics<arbitrary>], iteration_bounds = array<i64: 2>, scalar_prefetch = 0 : i64, scratch_operands = 0 : i64, tpu.core_type = #tpu.core_type<tc>, window_params = [{pipeline_mode = #tpu.pipeline_mode<synchronous>, transform_indices = @transform_0, window_bounds = array<i64: 8, 128>}, {pipeline_mode = #tpu.pipeline_mode<synchronous>, transform_indices = @transform_1, window_bounds = array<i64: 8, 128>}]} {
    %c0 = arith.constant 0 : index
    %c0_0 = arith.constant 0 : index
    %0 = vector.load %arg1[%c0, %c0_0] : memref<8x128xf32, #tpu.memory_space<vmem>>, vector<8x128xf32>
    %cst = arith.constant 2.000000e+00 : f32
    %1 = vector.broadcast %cst : f32 to vector<8x128xf32>
    %2 = arith.mulf %0, %1 : vector<8x128xf32>
    %c0_1 = arith.constant 0 : index
    %c0_2 = arith.constant 0 : index
    %3 = vector.load %arg2[%c0_1, %c0_2] : memref<8x128xf32, #tpu.memory_space<vmem>>, vector<8x128xf32>
    tpu.vector_store %arg2[%c0_1, %c0_2], %2 {strides = array<i32>} : memref<8x128xf32, #tpu.memory_space<vmem>>, vector<8x128xf32>,
    return
  }
  func.func @transform_0(%arg0: i32) -> (i32, i32) {
    %c0_i32 = arith.constant 0 : i32
    %c0_i32_0 = arith.constant 0 : i32
    %c0_i32_1 = arith.constant 0 : i32
    return %c0_i32, %c0_i32_0 : i32, i32
  }
  func.func @transform_1(%arg0: i32) -> (i32, i32) {
    %c0_i32 = arith.constant 0 : i32
    %c0_i32_0 = arith.constant 0 : i32
    %c0_i32_1 = arith.constant 0 : i32
    return %c0_i32, %c0_i32_0 : i32, i32
  }
}

module attributes {stable_mosaic.version = 11 : i64} {
  func.func @transform_kernel(%arg0: i32, %arg1: memref<256x128xf32, #tpu.memory_space<vmem>>, %arg2: memref<128x128xbf16, #tpu.memory_space<vmem>>, %arg3: memref<1x128xf32, #tpu.memory_space<vmem>>, %arg4: memref<1x128xf32, #tpu.memory_space<vmem>>, %arg5: memref<1x128xf32, #tpu.memory_space<vmem>>, %arg6: memref<256x128xbf16, #tpu.memory_space<vmem>>) attributes {dimension_semantics = [#tpu.dimension_semantics<parallel>], iteration_bounds = array<i64: 4>, scalar_prefetch = 0 : i64, scratch_operands = 0 : i64, tpu.core_type = #tpu.core_type<tc>, window_params = [{transform_indices = @transform_0, window_bounds = array<i64: 256, 128>}, {pipeline_mode = #tpu.pipeline_mode<synchronous>, transform_indices = @transform_1, window_bounds = array<i64: 128, 128>}, {pipeline_mode = #tpu.pipeline_mode<synchronous>, transform_indices = @transform_2, window_bounds = array<i64: 1, 128>}, {pipeline_mode = #tpu.pipeline_mode<synchronous>, transform_indices = @transform_3, window_bounds = array<i64: 1, 128>}, {pipeline_mode = #tpu.pipeline_mode<synchronous>, transform_indices = @transform_4, window_bounds = array<i64: 1, 128>}, {transform_indices = @transform_5, window_bounds = array<i64: 256, 128>}]} {
    %c0 = arith.constant 0 : index
    %c0_0 = arith.constant 0 : index
    %0 = vector.load %arg1[%c0, %c0_0] : memref<256x128xf32, #tpu.memory_space<vmem>>, vector<256x128xf32>
    %1 = arith.truncf %0 : vector<256x128xf32> to vector<256x128xbf16>
    %c0_1 = arith.constant 0 : index
    %c0_2 = arith.constant 0 : index
    %2 = vector.load %arg2[%c0_1, %c0_2] : memref<128x128xbf16, #tpu.memory_space<vmem>>, vector<128x128xbf16>
    %cst = arith.constant dense<0.000000e+00> : vector<256x128xf32>
    %3 = tpu.matmul %1, %2, %cst {dimension_numbers = #tpu.dot_dimension_numbers<[1], [0], [0], [1], [0, 0, 1, 1], [], []>} : vector<256x128xbf16>, vector<128x128xbf16>, vector<256x128xf32> -> vector<256x128xf32>
    %c0_3 = arith.constant 0 : index
    %c0_4 = arith.constant 0 : index
    %4 = vector.load %arg3[%c0_3, %c0_4] : memref<1x128xf32, #tpu.memory_space<vmem>>, vector<1x128xf32>
    %5 = vector.broadcast %4 : vector<1x128xf32> to vector<256x128xf32>
    %6 = arith.addf %3, %5 : vector<256x128xf32>
    %cst_5 = arith.constant 5.000000e-01 : f32
    %7 = vector.broadcast %cst_5 : f32 to vector<256x128xf32>
    %8 = arith.mulf %7, %6 : vector<256x128xf32>
    %cst_6 = arith.constant 4.471500e-02 : f32
    %9 = vector.broadcast %cst_6 : f32 to vector<256x128xf32>
    %10 = arith.mulf %9, %6 : vector<256x128xf32>
    %11 = arith.mulf %10, %6 : vector<256x128xf32>
    %12 = arith.mulf %11, %6 : vector<256x128xf32>
    %13 = arith.addf %6, %12 : vector<256x128xf32>
    %cst_7 = arith.constant 0.797884583 : f32
    %14 = vector.broadcast %cst_7 : f32 to vector<256x128xf32>
    %15 = arith.mulf %14, %13 : vector<256x128xf32>
    %16 = math.tanh %15 : vector<256x128xf32>
    %cst_8 = arith.constant 1.000000e+00 : f32
    %17 = vector.broadcast %cst_8 : f32 to vector<256x128xf32>
    %18 = arith.addf %17, %16 : vector<256x128xf32>
    %19 = arith.mulf %8, %18 : vector<256x128xf32>
    %c0_9 = arith.constant 0 : index
    %c0_10 = arith.constant 0 : index
    %20 = vector.load %arg4[%c0_9, %c0_10] : memref<1x128xf32, #tpu.memory_space<vmem>>, vector<1x128xf32>
    %c0_11 = arith.constant 0 : index
    %c0_12 = arith.constant 0 : index
    %21 = vector.load %arg5[%c0_11, %c0_12] : memref<1x128xf32, #tpu.memory_space<vmem>>, vector<1x128xf32>
    %cst_13 = arith.constant dense<0.000000e+00> : vector<256xf32>
    %22 = vector.multi_reduction <add>, %19, %cst_13 [1] : vector<256x128xf32> to vector<256xf32>
    %23 = vector.shape_cast %22 : vector<256xf32> to vector<256x1xf32>
    %cst_14 = arith.constant 1.280000e+02 : f32
    %24 = vector.broadcast %cst_14 : f32 to vector<256x1xf32>
    %25 = arith.divf %23, %24 : vector<256x1xf32>
    %26 = vector.broadcast %25 : vector<256x1xf32> to vector<256x128xf32>
    %27 = arith.subf %19, %26 : vector<256x128xf32>
    %28 = arith.mulf %27, %27 : vector<256x128xf32>
    %cst_15 = arith.constant dense<0.000000e+00> : vector<256xf32>
    %29 = vector.multi_reduction <add>, %28, %cst_15 [1] : vector<256x128xf32> to vector<256xf32>
    %30 = vector.shape_cast %29 : vector<256xf32> to vector<256x1xf32>
    %cst_16 = arith.constant 1.280000e+02 : f32
    %31 = vector.broadcast %cst_16 : f32 to vector<256x1xf32>
    %32 = arith.divf %30, %31 : vector<256x1xf32>
    %33 = vector.broadcast %25 : vector<256x1xf32> to vector<256x128xf32>
    %34 = arith.subf %19, %33 : vector<256x128xf32>
    %cst_17 = arith.constant 9.99999996E-13 : f32
    %35 = vector.broadcast %cst_17 : f32 to vector<256x1xf32>
    %36 = arith.addf %32, %35 : vector<256x1xf32>
    %37 = math.rsqrt %36 : vector<256x1xf32>
    %38 = vector.broadcast %37 : vector<256x1xf32> to vector<256x128xf32>
    %39 = arith.mulf %34, %38 : vector<256x128xf32>
    %40 = vector.broadcast %20 : vector<1x128xf32> to vector<256x128xf32>
    %41 = arith.mulf %39, %40 : vector<256x128xf32>
    %42 = vector.broadcast %21 : vector<1x128xf32> to vector<256x128xf32>
    %43 = arith.addf %41, %42 : vector<256x128xf32>
    %44 = arith.truncf %43 : vector<256x128xf32> to vector<256x128xbf16>
    %c0_18 = arith.constant 0 : index
    %c0_19 = arith.constant 0 : index
    %45 = vector.load %arg6[%c0_18, %c0_19] : memref<256x128xbf16, #tpu.memory_space<vmem>>, vector<256x128xbf16>
    tpu.vector_store %arg6[%c0_18, %c0_19], %44 {strides = array<i32>} : memref<256x128xbf16, #tpu.memory_space<vmem>>, vector<256x128xbf16>,
    return
  }
  func.func @transform_0(%arg0: i32) -> (i32, i32) {
    %c0_i32 = arith.constant 0 : i32
    %c0_i32_0 = arith.constant 0 : i32
    return %arg0, %c0_i32 : i32, i32
  }
  func.func @transform_1(%arg0: i32) -> (i32, i32) {
    %c0_i32 = arith.constant 0 : i32
    %c0_i32_0 = arith.constant 0 : i32
    %c0_i32_1 = arith.constant 0 : i32
    return %c0_i32, %c0_i32_0 : i32, i32
  }
  func.func @transform_2(%arg0: i32) -> (i32, i32) {
    %c0_i32 = arith.constant 0 : i32
    %c0_i32_0 = arith.constant 0 : i32
    %c0_i32_1 = arith.constant 0 : i32
    return %c0_i32, %c0_i32_0 : i32, i32
  }
  func.func @transform_3(%arg0: i32) -> (i32, i32) {
    %c0_i32 = arith.constant 0 : i32
    %c0_i32_0 = arith.constant 0 : i32
    %c0_i32_1 = arith.constant 0 : i32
    return %c0_i32, %c0_i32_0 : i32, i32
  }
  func.func @transform_4(%arg0: i32) -> (i32, i32) {
    %c0_i32 = arith.constant 0 : i32
    %c0_i32_0 = arith.constant 0 : i32
    %c0_i32_1 = arith.constant 0 : i32
    return %c0_i32, %c0_i32_0 : i32, i32
  }
  func.func @transform_5(%arg0: i32) -> (i32, i32) {
    %c0_i32 = arith.constant 0 : i32
    %c0_i32_0 = arith.constant 0 : i32
    return %arg0, %c0_i32 : i32, i32
  }
}

</mosaic_0001>

<bundles_post_ra>
// kernel: tpu_custom_call.1
= control target key start
LH: loop header
LB: loop body
LE: loop exit
PB: predicated region body
PF: predicated region fallthrough
CT: control target
= control target key end

     0   :  { %6 = vsyncpa [#allocation3], 0  ;;  %s305_s0 = inlined_call_operand.hbm [shape: f32[8,128], index: 0, kind: input, shape index: {}]   ;;  %s306_s1 = inlined_call_operand.hbm [shape: f32[8,128], index: 1, kind: output, shape index: {}]  }
   0x1   :  { %7 = vsyncpa [#allocation4], 0  ;;  %s258_s6 = smov 0  }
   0x2 LB: > { %s145_s7 = sadd.s32 4294967295, %s244_s6   ;;  %p146_p0 = scmp.ge.s32.totalorder %s244_s6, 1  ;;  %s244_s6 = sphi %s258_s6, %s13_s6  }
   0x3   : > { %p60_p1 = scmp.lt.s32.totalorder %s244_s6, 3  ;;  %p270_p3 = scmp.eq.s32.totalorder %s145_s7, 0 }
   0x4   : > { %s246_s10 = smov [#allocation2]  }
   0x5   : > { %p266_p2 = pnand %p146_p0, %p60_p1  ;;  %s73_s11 = sshll.u32 %s246_s10, 4  ;;  %s74_s11 = int_to_ptr.vmem [resolvable:$true] %s73_s11 }
   0x6   : > { %s191_s12 = scalar_lea.vmem %s74_s11, 128  ;;  %p199_p10 = scmp.lt.s32.totalorder %s74_s11, %s74_s11 }
   0x7   : > { %p162_p4 = pneg %p266_p2  ;;  %p192_p7 = scmp.ne.s32.totalorder %s74_s11, %s191_s12 }
   0x8   : > { %p200_p11 = scmp.lt.s32.totalorder %s191_s12, %s191_s12 }
   0x9   : > { %p163_p5 = pnand %p270_p3, %p162_p4 }
   0xa   : > { %p201_p12 = por %p200_p11, %p199_p10 }
   0xb   : > { %p182_p6 = pneg %p163_p5 }
   0xd   : > { %p194_p8 = pnand %p192_p7, %p182_p6 }
   0xf   : > { %p195_p9 = pneg %p194_p8 }
  0x11   : > { %p202_p13 = pnand %p201_p12, %p195_p9 }
  0x13   : > { %205 = shalt.err (!%p202_p13)
}
  0x14   : > { %165 = dma.hbm_to_vmem [thread:$0]  (!%p163_p5), %s305_s0, 128, %s74_s11, [#allocation3]  }
  0x15   : > { %86 = sbr.rel (%p266_p2) target bundleno = 42 (0x2a), region = 24 }
  0x1a   : > { %235 = dma.done.wait (%p270_p3), [#allocation3], 128  }
  0x1b   : > { %237 = vsyncadd (%p270_p3), [#allocation3], 4294967168  ;;  %s247_s15 = smov [#allocation5]   ;;  %v96_v0 = vld [vmem:[#allocation2] sm:$0xff]  ;;  %p287_p0 = scmp.eq.s32.totalorder %s145_s7, 1 }
  0x1c   : > { %s106_s16 = sshll.u32 %s247_s15, 4  ;;  %v97_v1 = vmul.f32 2.0, %v96_v0  ;;  %s107_s16 = int_to_ptr.vmem [resolvable:$true] %s106_s16 }
  0x1d   : > { %s206_s18 = scalar_lea.vmem %s107_s16, 128  ;;  %p213_p5 = scmp.lt.s32.totalorder %s107_s16, %s107_s16 }
  0x1e   : > { %98 = vst [vmem:[#allocation5] sm:$0xff] %v97_v1  ;;  %p207_p1 = scmp.ne.s32.totalorder %s107_s16, %s206_s18  ;;  %p214_p6 = scmp.lt.s32.totalorder %s206_s18, %s206_s18 }
  0x20   : > { %p208_p2 = pnand %p207_p1, %p287_p0  ;;  %p215_p7 = por %p214_p6, %p213_p5 }
  0x22   : > { %p209_p4 = pneg %p208_p2 }
  0x24   : > { %p216_p3 = pnand %p215_p7, %p209_p4 }
  0x26   : > { %219 = shalt.err (!%p216_p3)
}
  0x27   : > { %159 = dma.vmem_to_hbm [thread:$0]  (%p287_p0), %s107_s16, 128, %s306_s1, [#allocation4]  }
  0x28   : > { %239 = dma.done.wait (%p287_p0), [#allocation4], 128  }
  0x29   : > { %241 = vsyncadd (%p287_p0), [#allocation4], 4294967168 }
  0x2a PF: > { %s13_s6 = sadd.s32 1, %s244_s6  }
  0x2b   : > { %p10_p8 = scmp.ge.s32.totalorder %s13_s6, 4  }
  0x2d   :  { %12 = sbr.rel (!%p10_p8) target bundleno = 2 (0x2), region = 53 }
  0x32   :  { %119 = vsyncpa [#allocation3], 1 }
  0x33   :  { %121 = vsyncpa [#allocation3 + $0x1], 1 }
  0x34   :  { %122 = vsyncpa [#allocation4], 1 }
  0x35   :  { %124 = vsyncpa [#allocation4 + $0x1], 1 }

// kernel: tpu_custom_call.1
= control target key start
LH: loop header
LB: loop body
LE: loop exit
PB: predicated region body
PF: predicated region fallthrough
CT: control target
= control target key end

     0   :  { %10 = vsyncpa [#allocation3], 0  ;;  %s3056_s0 = inlined_call_operand.hbm [shape: f32[1024,128], index: 0, kind: input, shape index: {}]   ;;  %s3057_s1 = inlined_call_operand.hbm [shape: bf16[128,128], index: 1, kind: input, shape index: {}]   ;;  %s3058_s2 = inlined_call_operand.vmem [shape: f32[1,128], index: 2, kind: input, shape index: {}]   ;;  %s3059_s3 = inlined_call_operand.vmem [shape: f32[1,128], index: 3, kind: input, shape index: {}]   ;;  %s3060_s4 = inlined_call_operand.vmem [shape: f32[1,128], index: 4, kind: input, shape index: {}]   ;;  %s3061_s5 = inlined_call_operand.hbm [shape: bf16[1024,128], index: 5, kind: output, shape index: {}]  }
   0x1   :  { %12 = vsyncpa [#allocation3 + $0x1], 0 }
   0x2   :  { %13 = vsyncpa [#allocation6], 0 }
   0x3   :  { %14 = vsyncpa [#allocation4], 0 }
   0x4   :  { %16 = vsyncpa [#allocation4 + $0x1], 0  ;;  %s2155_s18 = smov 0   ;;  %s2157_s19 = smov 0  }
   0x5   :  { %s2159_s20 = smov 0   ;;  %s2161_s21 = smov 0  }
   0x6 LB: > { %s2176_s22 = sadd.s32 4294967295, %s2114_s21   ;;  %s1517_s23 = sadd.s32 4294967294, %s2114_s21   ;;  %s2114_s21 = sphi %s2161_s21, %s3082_s21   ;;  %s2110_s20 = sphi %s2159_s20, %s3081_s20   ;;  %s2106_s19 = sphi %s2157_s19, %s3080_s19   ;;  %s2102_s18 = sphi %s2155_s18, %s3079_s18  }
   0x7   : > { %p42_p0 = scmp.ne.s32.totalorder %s2106_s19, %s2102_s18  ;;  %p3062_p1 = scmp.eq.s32.totalorder %s2176_s22, 0 }
   0x8   : > { %p156_p3 = scmp.eq.s32.totalorder %s1517_s23, 3  ;;  %p1518_p5 = scmp.ge.s32.totalorder %s2114_s21, 1 }
   0x9   : > { %p2185_p4 = por %p3062_p1, %p42_p0  ;;  %p163_p7 = scmp.lt.s32.totalorder %s2114_s21, 5 }
   0xa   : > { %p2190_p6 = por %p156_p3, %p42_p0  ;;  %s2116_s27 = smov [#allocation5]  }
   0xb   : > { %s3066_s24 = scalar_select %p2185_p4, 1, 0 }
   0xc   : > { %s3067_s25 = scalar_select %p2190_p6, 1, 0 }
   0xd   : > { %p2195_p8 = pnand %p1518_p5, %p163_p7  ;;  %s175_s28 = sshll.u32 %s2116_s27, 4  ;;  %s176_s28 = int_to_ptr.vmem [resolvable:$true] %s175_s28 }
   0xe   : > { %s2208_s30 = sadd.s32 1, %s2114_s21   ;;  %s29_s6 = sadd.s32 1, %s2110_s20 }
   0xf   : > { %s3068_s26 = scalar_select %p2195_p8, 1, 0 }
  0x10   : > { %p1801_p9 = pneg %p2195_p8  ;;  %s26_s7 = ssub.s32 %s2114_s21, %s2208_s30 }
  0x11   : > { %s2003_s8 = scalar_lea.vmem %s176_s28, 1024  ;;  %p2011_p3 = scmp.lt.s32.totalorder %s176_s28, %s176_s28 }
  0x12   : > { %p2203_p10 = pnand %p1801_p9, %p3062_p1  ;;  %p2004_p12 = scmp.ne.s32.totalorder %s176_s28, %s2003_s8 }
  0x13   : > { %p2012_p5 = scmp.lt.s32.totalorder %s2003_s8, %s2003_s8 }
  0x14   : > { %p1994_p11 = pneg %p2203_p10 }
  0x15   : > { %p2013_p7 = por %p2012_p5, %p2011_p3 }
  0x16   : > { %p2006_p13 = pnand %p2004_p12, %p1994_p11 }
  0x18   : > { %p2007_p0 = pneg %p2006_p13 }
  0x1a   : > { %p2014_p2 = pnand %p2013_p7, %p2007_p0 }
  0x1c   : > { %2017 = shalt.err (!%p2014_p2)
}
  0x1d   : > { %s2117_s9 = smov 64   ;;  %s2118_s10 = smov 4  }
  0x1e   : > { %1804 = dma.hbm_to_vmem [thread:$0]  (!%p2203_p10), %s3057_s1, 1024, %s176_s28, [#allocation6], %s2117_s9, %s2117_s9, %s2118_s10  }
  0x1f   : > { %p27_p9 = scmp.eq.s32.totalorder %s26_s7, 0  ;;  %p36_p11 = scmp.ne.s32.totalorder %s2110_s20, %s2106_s19 }
  0x20   : > { %p37_p12 = scmp.eq.s32.totalorder %s2114_s21, 0  ;;  %p1814_p2 = scmp.lt.s32.totalorder %s2114_s21, 4 }
  0x21   : > { %s2225_s13 = scalar_select %p27_p9, %s2110_s20, %s29_s6  }
  0x22   : > { %p38_p13 = por %p37_p12, %p36_p11  ;;  %p3070_p0 = scmp.eq.s32.totalorder %s2176_s22, 3 }
  0x23   : > { %s198_s15 = sand.u32 1, %s2110_s20   ;;  %s1576_s16 = sshll.u32 %s2114_s21, 12 }
  0x24   : > { %p2229_p3 = por %p3070_p0, %p36_p11  ;;  %s1521_s17 = sshll.u32 %s198_s15, 8 }
  0x25   : > { %s2238_s29 = scalar_lea.hbm %s3056_s0, %s1576_s16  ;;  %s202_s28 = scalar_lea.vmem [#allocation2], %s1521_s17 }
  0x26   : > { %s3071_s14 = scalar_select %p2229_p3, 1, 0 }
  0x27   : > { %s209_s6 = sshll.u32 %s202_s28, 4  ;;  %p2240_p10 = pnand %p1814_p2, %p38_p13  ;;  %s2244_s6 = int_to_ptr.vmem [resolvable:$true] %s209_s6 }
  0x28   : > { %s2246_s8 = scalar_lea.sflag [#allocation3], %s198_s15  ;;  %s2018_s9 = scalar_lea.hbm %s2238_s29, 4096 }
  0x29   : > { %p2019_p5 = scmp.ne.s32.totalorder %s2238_s29, %s2018_s9  ;;  %p2020_p7 = pneg %p2240_p10 }
  0x2a   : > { %s2023_s12 = scalar_lea.hbm %s3056_s0, 16384  ;;  %p2024_p12 = scmp.lt.s32.totalorder %s2238_s29, %s3056_s0 }
  0x2b   : > { %p2021_p9 = pnand %p2020_p7, %p2019_p5  ;;  %p2025_p2 = scmp.lt.s32.totalorder %s2023_s12, %s2018_s9 }
  0x2d   : > { %p2022_p11 = pneg %p2021_p9  ;;  %p2026_p13 = por %p2025_p2, %p2024_p12 }
  0x2f   : > { %p2027_p0 = pnand %p2026_p13, %p2022_p11 }
  0x31   : > { %2030 = shalt.err (!%p2027_p0)
}
  0x32   : > { %s2031_s15 = scalar_lea.vmem %s2244_s6, 4096  ;;  %s2119_s23 = smov [#allocation2]  }
  0x33   : > { %p2032_p1 = scmp.ne.s32.totalorder %s2244_s6, %s2031_s15  ;;  %s2036_s27 = sshll.u32 %s2119_s23, 4  ;;  %s2037_s27 = int_to_ptr.vmem [resolvable:$false] %s2036_s27 }
  0x34   : > { %s2038_s28 = scalar_lea.vmem %s2037_s27, 8192  ;;  %p2039_p9 = scmp.lt.s32.totalorder %s2244_s6, %s2037_s27 }
  0x35   : > { %p2034_p6 = pnand %p2032_p1, %p2020_p7  ;;  %p2040_p3 = scmp.lt.s32.totalorder %s2038_s28, %s2031_s15 }
  0x37   : > { %p2035_p5 = pneg %p2034_p6  ;;  %p2041_p4 = por %p2040_p3, %p2039_p9 }
  0x39   : > { %p2042_p8 = pnand %p2041_p4, %p2035_p5 }
  0x3b   : > { %2045 = shalt.err (!%p2042_p8)
}
  0x3c   : > { %s2120_s9 = smov 128   ;;  %s2121_s10 = smov 8  }
  0x3d   : > { %1808 = dma.hbm_to_vmem [thread:$0]  (!%p2240_p10), %s2238_s29, 4096, %s2244_s6, %s2246_s8, %s2120_s9, %s2120_s9, %s2121_s10  }
  0x3e   : > { %p3073_p1 = scmp.ne.s32.totalorder %s3068_s26, 0 }
  0x3f   : > { %s2270_s11 = sand.u32 (!%p3073_p1), 1, %s2106_s19   ;;  %p3074_p4 = scmp.ne.s32.totalorder (!%p3073_p1), %s3066_s24, 0 }
  0x40   : > { %221 = sbr.rel (%p3073_p1) target bundleno = 719 (0x2cf), region = 40  ;;  %s1525_s12 = sshll.u32 (!%p3073_p1), %s2270_s11, 8 }
  0x41   : > { %s224_s16 = scalar_lea.sflag (!%p3073_p1), [#allocation3], %s2270_s11  ;;  %s2274_s17 = scalar_lea.vmem (!%p3073_p1), [#allocation2], %s1525_s12 }
  0x45   : > { %2089 = dma.done.wait (%p3074_p4), %s224_s16, 4096  }
  0x46   : > { %2091 = vsyncadd (%p3074_p4), %s224_s16, 4294963200  ;;  %p3075_p6 = scmp.eq.s32.totalorder %s2176_s22, 0 }
  0x48   : > { %2093 = dma.done.wait (%p3075_p6), [#allocation6], 1024   ;;  %p3076_p8 = pmov %p3075_p6 }
  0x49   : > { %v1856_v0 = vld [vmem:[#allocation5 + $0x38] sm:$0xff]   ;;  %v1857_v1 = vld [vmem:[#allocation5 + $0x30] sm:$0xff]   ;;  %v1858_v2 = vld [vmem:[#allocation5 + $0x28] sm:$0xff]   ;;  %s1527_s15 = sshll.u32 %s2270_s11, 7  ;;  %s1609_s27 = sshll.u32 %s2176_s22, 11 }
  0x4a   : > { %2095 = vsyncadd (%p3076_p8), [#allocation6], 4294966272  ;;  %1729 = vmatprep.subr.bf16.mxu0 %v1856_v0  ;;  %1777 = vmatprep.subr.bf16.mxu1 %v1856_v0  ;;  %v1859_v3 = vld [vmem:[#allocation5 + $0x20] sm:$0xff]   ;;  %v262_v5 = vld [vmem:[%s2274_s17 + $0x8] sm:$0xff]  ;;  %s2904_s23 = scalar_lea.vmem [#allocation7], %s1527_s15  ;;  %s3011_s12 = scalar_lea.hbm %s3061_s5, %s1609_s27 }
  0x4b   : > { %1730 = vmatpush3.bf16.msra.mxu0 %v1856_v0  ;;  %1785 = vmatpush3.bf16.msra.mxu1 %v1856_v0  ;;  %v261_v4 = vld [vmem:[%s2274_s17] sm:$0xff]  ;;  %v278_v8 = vld [vmem:[%s2274_s17 + $0x88] sm:$0xff]  ;;  %v1860_v10 = vld [vmem:[#allocation5 + $0x18] sm:$0xff]   ;;  %s1434_s28 = sshll.u32 %s2904_s23, 4  ;;  %s1421_s16 = scalar_lea.sflag [#allocation4], %s2270_s11  ;;  %s3013_s28 = int_to_ptr.vmem [resolvable:$true] %s1434_s28 }
  0x4c   : > { %1731 = vmatprep.subr.bf16.mxu0 %v1857_v1  ;;  %1778 = vmatprep.subr.bf16.mxu1 %v1857_v1  ;;  %v277_v6 = vld [vmem:[%s2274_s17 + $0x80] sm:$0xff]  ;;  %v293_v7 = vpack.c.bf16 %v262_v5, %v261_v4  ;;  %v1861_v11 = vld [vmem:[#allocation5 + $0x10] sm:$0xff]   ;;  %v1862_v12 = vld [vmem:[#allocation5 + $0x8] sm:$0xff]   ;;  %s2046_s22 = scalar_lea.vmem %s3013_s28, 2048  ;;  %p3077_p10 = scmp.ne.s32.totalorder %s3071_s14, 0 }
  0x4d   : > { %v301_v9 = vpack.c.bf16 %v278_v8, %v277_v6  ;;  %v1863_v13 = vld [vmem:[#allocation5] sm:$0xff]   ;;  %v263_v14 = vld [vmem:[%s2274_s17 + $0x10] sm:$0xff]  ;;  %v264_v15 = vld [vmem:[%s2274_s17 + $0x18] sm:$0xff]  ;;  %p2047_p3 = scmp.ne.s32.totalorder %s3013_s28, %s2046_s22 }
  0x4e   : > { %1745 = vmatprep.mubr.bf16.mxu0 %v293_v7  ;;  %v279_v16 = vld [vmem:[%s2274_s17 + $0x90] sm:$0xff]  ;;  %v280_v17 = vld [vmem:[%s2274_s17 + $0x98] sm:$0xff]  ;;  %v265_v18 = vld [vmem:[%s2274_s17 + $0x20] sm:$0xff]  ;;  %v294_v22 = vpack.c.bf16 %v264_v15, %v263_v14 }
  0x4f   : > { %1732 = vmatpush3.bf16.msra.mxu0 %v1857_v1  ;;  %1786 = vmatpush3.bf16.msra.mxu1 %v1857_v1  ;;  %v266_v19 = vld [vmem:[%s2274_s17 + $0x28] sm:$0xff]  ;;  %v281_v20 = vld [vmem:[%s2274_s17 + $0xa0] sm:$0xff]  ;;  %v302_v23 = vpack.c.bf16 %v280_v17, %v279_v16  ;;  %v267_v26 = vld [vmem:[%s2274_s17 + $0x30] sm:$0xff]  ;;  %p2048_p7 = pnand %p2047_p3, %p3077_p10 }
  0x50   : > { %1733 = vmatprep.subr.bf16.mxu0 %v1858_v2  ;;  %1779 = vmatprep.subr.bf16.mxu1 %v1858_v2  ;;  %v282_v21 = vld [vmem:[%s2274_s17 + $0xa8] sm:$0xff]  ;;  %v295_v24 = vpack.c.bf16 %v266_v19, %v265_v18  ;;  %v268_v27 = vld [vmem:[%s2274_s17 + $0x38] sm:$0xff]  ;;  %v283_v28 = vld [vmem:[%s2274_s17 + $0xb0] sm:$0xff] }
  0x51   : > { %1761 = vmatprep.mubr.bf16.mxu1 %v301_v9  ;;  %v303_v25 = vpack.c.bf16 %v282_v21, %v281_v20  ;;  %v284_v29 = vld [vmem:[%s2274_s17 + $0xb8] sm:$0xff]  ;;  %v269_v30 = vld [vmem:[%s2274_s17 + $0x40] sm:$0xff]  ;;  %v270_v31 = vld [vmem:[%s2274_s17 + $0x48] sm:$0xff]  ;;  %v296_v34 = vpack.c.bf16 %v268_v27, %v267_v26  ;;  %p2049_p11 = pneg %p2048_p7 }
  0x52   : > { %v285_v32 = vld [vmem:[%s2274_s17 + $0xc0] sm:$0xff]  ;;  %v286_v33 = vld [vmem:[%s2274_s17 + $0xc8] sm:$0xff]  ;;  %v304_v35 = vpack.c.bf16 %v284_v29, %v283_v28  ;;  %v297_v36 = vpack.c.bf16 %v270_v31, %v269_v30  ;;  %v271_v38 = vld [vmem:[%s2274_s17 + $0x50] sm:$0xff] }
  0x53   : > { %1734 = vmatpush3.bf16.msra.mxu0 %v1858_v2  ;;  %1787 = vmatpush3.bf16.msra.mxu1 %v1858_v2  ;;  %v305_v37 = vpack.c.bf16 %v286_v33, %v285_v32  ;;  %v272_v39 = vld [vmem:[%s2274_s17 + $0x58] sm:$0xff]  ;;  %v287_v40 = vld [vmem:[%s2274_s17 + $0xd0] sm:$0xff]  ;;  %v273_v42 = vld [vmem:[%s2274_s17 + $0x60] sm:$0xff] }
  0x54   : > { %1735 = vmatprep.subr.bf16.mxu0 %v1859_v3  ;;  %1780 = vmatprep.subr.bf16.mxu1 %v1859_v3  ;;  %v288_v41 = vld [vmem:[%s2274_s17 + $0xd8] sm:$0xff]  ;;  %v274_v43 = vld [vmem:[%s2274_s17 + $0x68] sm:$0xff]  ;;  %v289_v44 = vld [vmem:[%s2274_s17 + $0xe0] sm:$0xff]  ;;  %v298_v46 = vpack.c.bf16 %v272_v39, %v271_v38 }
  0x55   : > { %v290_v45 = vld [vmem:[%s2274_s17 + $0xe8] sm:$0xff]  ;;  %v306_v47 = vpack.c.bf16 %v288_v41, %v287_v40  ;;  %v299_v48 = vpack.c.bf16 %v274_v43, %v273_v42  ;;  %v275_v50 = vld [vmem:[%s2274_s17 + $0x70] sm:$0xff]  ;;  %v276_v51 = vld [vmem:[%s2274_s17 + $0x78] sm:$0xff] }
  0x56   : > { %v307_v49 = vpack.c.bf16 %v290_v45, %v289_v44  ;;  %v291_v52 = vld [vmem:[%s2274_s17 + $0xf0] sm:$0xff]  ;;  %v292_v53 = vld [vmem:[%s2274_s17 + $0xf8] sm:$0xff]  ;;  %v300_v54 = vpack.c.bf16 %v276_v51, %v275_v50  ;;  %v2319_v56 = vld [vmem:[%s3058_s2] ss:$0 sm:$0xff]  ;;  %s2122_s17 = smov [#allocation7]  }
  0x57   : > { %1736 = vmatpush3.bf16.msra.mxu0 %v1859_v3  ;;  %1788 = vmatpush3.bf16.msra.mxu1 %v1859_v3  ;;  %v308_v55 = vpack.c.bf16 %v292_v53, %v291_v52  ;;  %s2050_s24 = sshll.u32 %s2122_s17, 4  ;;  %s2051_s24 = int_to_ptr.vmem [resolvable:$false] %s2050_s24 }
  0x58   : > { %1737 = vmatprep.subr.bf16.mxu0 %v1860_v10  ;;  %1781 = vmatprep.subr.bf16.mxu1 %v1860_v10  ;;  %s2052_s26 = scalar_lea.vmem %s2051_s24, 4096  ;;  %p2053_p12 = scmp.lt.s32.totalorder %s3013_s28, %s2051_s24 }
  0x59   : > { %p2054_p2 = scmp.lt.s32.totalorder %s2052_s26, %s2046_s22 }
  0x5b   : > { %1738 = vmatpush3.bf16.msra.mxu0 %v1860_v10  ;;  %1789 = vmatpush3.bf16.msra.mxu1 %v1860_v10  ;;  %p2055_p13 = por %p2054_p2, %p2053_p12 }
  0x5c   : > { %1739 = vmatprep.subr.bf16.mxu0 %v1861_v11  ;;  %1782 = vmatprep.subr.bf16.mxu1 %v1861_v11 }
  0x5d   : > { %p2056_p0 = pnand %p2055_p13, %p2049_p11 }
  0x5f   : > { %1740 = vmatpush3.bf16.msra.mxu0 %v1861_v11  ;;  %1790 = vmatpush3.bf16.msra.mxu1 %v1861_v11 }
  0x60   : > { %1741 = vmatprep.subr.bf16.mxu0 %v1862_v12  ;;  %1783 = vmatprep.subr.bf16.mxu1 %v1862_v12 }
  0x63   : > { %1742 = vmatpush3.bf16.msra.mxu0 %v1862_v12  ;;  %1791 = vmatpush3.bf16.msra.mxu1 %v1862_v12 }
  0x64   : > { %1743 = vmatprep.subr.bf16.mxu0 %v1863_v13  ;;  %1784 = vmatprep.subr.bf16.mxu1 %v1863_v13 }
  0x67   : > { %1744 = vmatpush3.bf16.msra.mxu0 %v1863_v13  ;;  %1792 = vmatpush3.bf16.msra.mxu1 %v1863_v13 }
  0x6a   : > { %1746 = vmatmul.mubr.bf16.vlgmr.msra.gmra.mxu0 %v294_v22  ;;  %1762 = vmatmul.mubr.bf16.vlgmr.msra.gmra.mxu1 %v302_v23 }
  0x6b   : > { %1749 = vmatprep.mubr.bf16.mxu0 %v295_v24  ;;  %1765 = vmatprep.mubr.bf16.mxu1 %v303_v25 }
  0x72   : > { %1750 = vmatmul.mubr.bf16.gmra.mxu0 %v296_v34  ;;  %1766 = vmatmul.mubr.bf16.gmra.mxu1 %v304_v35 }
  0x73   : > { %1753 = vmatprep.mubr.bf16.mxu0 %v297_v36  ;;  %1769 = vmatprep.mubr.bf16.mxu1 %v305_v37 }
  0x7a   : > { %1754 = vmatmul.mubr.bf16.gmra.mxu0 %v298_v46  ;;  %1770 = vmatmul.mubr.bf16.gmra.mxu1 %v306_v47 }
  0x7b   : > { %1757 = vmatprep.mubr.bf16.mxu0 %v299_v48  ;;  %1773 = vmatprep.mubr.bf16.mxu1 %v307_v49 }
  0x82   : > { %1758 = vmatmul.mubr.bf16.gmra.mxu0 %v300_v54  ;;  %1774 = vmatmul.mubr.bf16.gmra.mxu1 %v308_v55 }
 0x12a   : > { %v1747_v57 = vpop.f32.mrf.mxu0  ;;  %v1763_v58 = vpop.f32.mrf.mxu1 }
 0x12b   : > { %v423_v59 = vadd.f32 %v1747_v57, %v2319_v56  ;;  %v487_v60 = vadd.f32 %v1763_v58, %v2319_v56 }
 0x12c   : > { %v414_v61 = vpop.f32.mrf.mxu0  ;;  %v478_v62 = vpop.f32.mrf.mxu1 }
 0x12d   : > { %v575_v63 = vmul.f32 0.044715, %v423_v59  ;;  %v591_v0 = vmul.f32 0.044715, %v487_v60  ;;  %v415_v1 = vadd.f32 %v2319_v56, %v414_v61  ;;  %v479_v10 = vadd.f32 %v2319_v56, %v478_v62 }
 0x12e   : > { %v1748_v2 = vpop.f32.mrf.mxu0  ;;  %v1764_v3 = vpop.f32.mrf.mxu1  ;;  %v2336_v34 = vmul.f32 0.5, %v487_v60  ;;  %v2338_v35 = vmul.f32 0.5, %v423_v59 }
 0x12f   : > { %v573_v4 = vmul.f32 0.044715, %v415_v1  ;;  %v426_v5 = vadd.f32 %v1748_v2, %v2319_v56  ;;  %v623_v8 = vmul.f32 %v591_v0, %v487_v60  ;;  %v607_v9 = vmul.f32 %v575_v63, %v423_v59 }
 0x130   : > { %v417_v6 = vpop.f32.mrf.mxu0  ;;  %v481_v7 = vpop.f32.mrf.mxu1  ;;  %v2327_v12 = vadd.f32 %v1764_v3, %v2319_v56  ;;  %v589_v24 = vmul.f32 0.044715, %v479_v10  ;;  %v2340_v39 = vmul.f32 0.5, %v415_v1  ;;  %v2342_v40 = vmul.f32 0.5, %v479_v10 }
 0x131   : > { %v576_v11 = vmul.f32 0.044715, %v426_v5  ;;  %v655_v15 = vmul.f32 %v623_v8, %v487_v60  ;;  %v639_v16 = vmul.f32 %v607_v9, %v423_v59  ;;  %v605_v17 = vmul.f32 %v573_v4, %v415_v1 }
 0x132   : > { %v1751_v13 = vpop.f32.mrf.mxu0  ;;  %v1767_v14 = vpop.f32.mrf.mxu1  ;;  %v592_v25 = vmul.f32 0.044715, %v2327_v12  ;;  %v2331_v26 = vadd.f32 %v2319_v56, %v481_v7  ;;  %v2334_v33 = vadd.f32 %v2319_v56, %v417_v6  ;;  %v621_v49 = vmul.f32 %v589_v24, %v479_v10 }
 0x133   : > { %v687_v20 = vadd.f32 %v655_v15, %v487_v60  ;;  %v671_v21 = vadd.f32 %v639_v16, %v423_v59  ;;  %v608_v22 = vmul.f32 %v576_v11, %v426_v5  ;;  %v637_v23 = vmul.f32 %v605_v17, %v415_v1 }
 0x134   : > { %v430_v18 = vpop.f32.mrf.mxu0  ;;  %v494_v19 = vpop.f32.mrf.mxu1  ;;  %v590_v41 = vmul.f32 0.044715, %v2331_v26  ;;  %v2346_v42 = vadd.f32 %v1751_v13, %v2319_v56  ;;  %v2349_v43 = vadd.f32 %v1767_v14, %v2319_v56  ;;  %v624_v48 = vmul.f32 %v592_v25, %v2327_v12 }
 0x135   : > { %v719_v29 = vmul.f32 0.7978846, %v687_v20  ;;  %v703_v30 = vmul.f32 0.7978846, %v671_v21  ;;  %v640_v31 = vmul.f32 %v608_v22, %v426_v5  ;;  %v669_v32 = vadd.f32 %v637_v23, %v415_v1 }
 0x136   : > { %v1752_v27 = vpop.f32.mrf.mxu0  ;;  %v1768_v28 = vpop.f32.mrf.mxu1  ;;  %v574_v50 = vmul.f32 0.044715, %v2334_v33  ;;  %v2354_v51 = vadd.f32 %v2319_v56, %v430_v18  ;;  %v2357_v52 = vadd.f32 %v2319_v56, %v494_v19  ;;  %v2359_v53 = vmul.f32 0.5, %v426_v5 }
 0x137   : > { %1864 = vtanh.f32 %v719_v29  ;;  %v672_v38 = vadd.f32 %v640_v31, %v426_v5  ;;  %v701_v44 = vmul.f32 0.7978846, %v669_v32  ;;  %v2362_v54 = vadd.f32 %v1752_v27, %v2319_v56 }
 0x138   : > { %v433_v36 = vpop.f32.mrf.mxu0  ;;  %v497_v37 = vpop.f32.mrf.mxu1  ;;  %1866 = vtanh.f32 %v703_v30  ;;  %v656_v58 = vmul.f32 %v624_v48, %v2327_v12  ;;  %v653_v59 = vmul.f32 %v621_v49, %v479_v10  ;;  %v2366_v60 = vmul.f32 0.044715, %v2346_v42 }
 0x139   : > { %v704_v47 = vmul.f32 0.7978846, %v672_v38  ;;  %v2369_v61 = vmul.f32 0.044715, %v2349_v43  ;;  %v2372_v62 = vadd.f32 %v1768_v28, %v2319_v56  ;;  %v2375_v63 = vadd.f32 %v2319_v56, %v433_v36 }
 0x13a   : > { %v1755_v45 = vpop.f32.mrf.mxu0  ;;  %v1771_v46 = vpop.f32.mrf.mxu1  ;;  %v688_v1 = vadd.f32 %v656_v58, %v2327_v12  ;;  %v685_v2 = vadd.f32 %v653_v59, %v479_v10  ;;  %v622_v3 = vmul.f32 %v590_v41, %v2331_v26  ;;  %v2380_v4 = vmul.f32 0.044715, %v2354_v51 }
 0x13b   : > { %1868 = vtanh.f32 %v704_v47  ;;  %v2383_v5 = vmul.f32 0.044715, %v2357_v52  ;;  %v2386_v6 = vadd.f32 %v2319_v56, %v497_v37  ;;  %v2389_v7 = vadd.f32 %v1755_v45, %v2319_v56 }
 0x13c   : > { %v446_v55 = vpop.f32.mrf.mxu0  ;;  %v510_v57 = vpop.f32.mrf.mxu1  ;;  %1870 = vtanh.f32 %v701_v44  ;;  %v580_v9 = vmul.f32 0.044715, %v2362_v54  ;;  %v720_v13 = vmul.f32 0.7978846, %v688_v1  ;;  %v717_v10 = vmul.f32 0.7978846, %v685_v2 }
 0x13d   : > { %v654_v14 = vmul.f32 %v622_v3, %v2331_v26  ;;  %v596_v15 = vmul.f32 0.044715, %v2372_v62  ;;  %v2395_v16 = vadd.f32 %v1771_v46, %v2319_v56  ;;  %v2398_v17 = vadd.f32 %v2319_v56, %v446_v55 }
 0x13e   : > { %v1756_v0 = vpop.f32.mrf.mxu0  ;;  %v1772_v8 = vpop.f32.mrf.mxu1  ;;  %v2401_v18 = vmul.f32 0.5, %v2327_v12  ;;  %v2404_v19 = vmul.f32 0.044715, %v2375_v63  ;;  %1872 = vtanh.f32 %v720_v13  ;;  %v606_v21 = vmul.f32 %v574_v50, %v2334_v33 }
 0x13f   : > { %v686_v20 = vadd.f32 %v654_v14, %v2331_v26  ;;  %v2409_v22 = vmul.f32 0.044715, %v2386_v6  ;;  %v2412_v23 = vmul.f32 0.044715, %v2389_v7  ;;  %v2415_v24 = vadd.f32 %v2319_v56, %v510_v57 }
 0x140   : > { %v449_v11 = vpop.f32.mrf.mxu0  ;;  %v513_v25 = vpop.f32.mrf.mxu1  ;;  %v2418_v27 = vmul.f32 0.5, %v2331_v26  ;;  %1874 = vtanh.f32 %v717_v10  ;;  %v638_v29 = vmul.f32 %v606_v21, %v2334_v33  ;;  %v612_v30 = vmul.f32 %v580_v9, %v2362_v54 }
 0x141   : > { %v718_v28 = vmul.f32 0.7978846, %v686_v20  ;;  %v2423_v32 = vmul.f32 0.044715, %v2395_v16  ;;  %v2426_v36 = vmul.f32 0.044715, %v2398_v17  ;;  %v2429_v37 = vadd.f32 %v1756_v0, %v2319_v56 }
 0x142   : > { %v1759_v12 = vpop.f32.mrf.mxu0  ;;  %v2432_v38 = vadd.f32 %v1772_v8, %v2319_v56  ;;  %v670_v41 = vadd.f32 %v638_v29, %v2334_v33  ;;  %v644_v44 = vmul.f32 %v612_v30, %v2362_v54  ;;  %v2437_v46 = vmul.f32 0.044715, %v2415_v24  ;;  %v1775_v50 = vpop.f32.mrf.mxu1 }
 0x143   : > { %1876 = vtanh.f32 %v718_v28  ;;  %v2440_v47 = vadd.f32 %v2319_v56, %v449_v11  ;;  %v2443_v48 = vadd.f32 %v2319_v56, %v513_v25  ;;  %v2446_v49 = vadd.f32 %v1759_v12, %v2319_v56 }
 0x144   : > { %v1865_v31 = vpop.eup %1864  ;;  %v462_v55 = vpop.f32.mrf.mxu0  ;;  %v702_v59 = vmul.f32 0.7978846, %v670_v41  ;;  %v676_v0 = vadd.f32 %v644_v44, %v2362_v54  ;;  %v2453_v2 = vmul.f32 0.044715, %v2429_v37  ;;  %v2456_v3 = vmul.f32 0.044715, %v2432_v38 }
 0x145   : > { %v783_v26 = vadd.f32 1.0, %v1865_v31  ;;  %v1867_v45 = vpop.eup %1866  ;;  %v2459_v8 = vmul.f32 0.5, %v2334_v33  ;;  %v2462_v9 = vmul.f32 0.5, %v2362_v54  ;;  %v2469_v14 = vmul.f32 0.044715, %v2440_v47  ;;  %v526_v54 = vpop.f32.mrf.mxu1 }
 0x146   : > { %v767_v58 = vadd.f32 1.0, %v1867_v45  ;;  %1878 = vtanh.f32 %v702_v59  ;;  %v708_v13 = vmul.f32 0.7978846, %v676_v0  ;;  %v2472_v20 = vmul.f32 0.044715, %v2443_v48  ;;  %v1760_v21 = vpop.f32.mrf.mxu0 }
 0x147   : > { %v2449_v57 = vmul.f32 %v783_v26, %v2336_v34  ;;  %v2475_v33 = vadd.f32 %v1775_v50, %v2319_v56  ;;  %v611_v25 = vmul.f32 %v2366_v60, %v2346_v42  ;;  %v2487_v29 = vadd.f32 %v2319_v56, %v462_v55  ;;  %v1776_v50 = vpop.f32.mrf.mxu1 }
 0x148   : > { %v1869_v1 = vpop.eup %1868  ;;  %v2466_v34 = vmul.f32 %v767_v58, %v2338_v35  ;;  %v2480_v35 = vmul.f32 0.044715, %v2446_v49  ;;  %1880 = vtanh.f32 %v708_v13  ;;  %v628_v31 = vmul.f32 %v596_v15, %v2372_v62 }
 0x149   : > { %867 = vadd.xlane.f32.xlu0 %v2449_v57  ;;  %v768_v11 = vadd.f32 1.0, %v1869_v1  ;;  %v1871_v10 = vpop.eup %1870  ;;  %v643_v30 = vmul.f32 %v611_v25, %v2346_v42  ;;  %v627_v60 = vmul.f32 %v2369_v61, %v2349_v43  ;;  %v2494_v26 = vadd.f32 %v2319_v56, %v526_v54 }
 0x14a   : > { %835 = vadd.xlane.f32.xlu1 %v2466_v34  ;;  %v765_v28 = vadd.f32 1.0, %v1871_v10  ;;  %v2497_v41 = vadd.f32 %v1760_v21, %v2319_v56  ;;  %v610_v44 = vmul.f32 %v2404_v19, %v2375_v63  ;;  %v660_v15 = vmul.f32 %v628_v31, %v2372_v62 }
 0x14b   : > { %v2484_v12 = vmul.f32 %v768_v11, %v2359_v53  ;;  %v1873_v45 = vpop.eup %1872  ;;  %v675_v55 = vadd.f32 %v643_v30, %v2346_v42  ;;  %v659_v61 = vmul.f32 %v627_v60, %v2349_v43  ;;  %v609_v58 = vmul.f32 %v2380_v4, %v2354_v51 }
 0x14c   : > { %v2500_v53 = vmul.f32 %v765_v28, %v2340_v39  ;;  %v2510_v59 = vadd.f32 %v1776_v50, %v2319_v56  ;;  %v784_v39 = vadd.f32 1.0, %v1873_v45  ;;  %v642_v19 = vmul.f32 %v610_v44, %v2375_v63 }
 0x14d   : > { %v626_v0 = vmul.f32 %v2409_v22, %v2386_v6  ;;  %v1875_v1 = vpop.eup %1874  ;;  %v707_v11 = vmul.f32 0.7978846, %v675_v55  ;;  %v692_v13 = vadd.f32 %v660_v15, %v2372_v62  ;;  %v691_v10 = vadd.f32 %v659_v61, %v2349_v43 }
 0x14e   : > { %837 = vadd.xlane.f32.xlu1 %v2484_v12  ;;  %831 = vadd.xlane.f32.xlu0 %v2500_v53  ;;  %v641_v4 = vmul.f32 %v609_v58, %v2354_v51  ;;  %v2521_v54 = vmul.f32 %v784_v39, %v2401_v18  ;;  %v781_v21 = vadd.f32 1.0, %v1875_v1  ;;  %v674_v25 = vadd.f32 %v642_v19, %v2375_v63  ;;  %v465_v1 = vpop.f32.mrf.mxu0 }
 0x14f   : > { %v658_v28 = vmul.f32 %v626_v0, %v2386_v6  ;;  %1882 = vtanh.f32 %v707_v11  ;;  %v724_v31 = vmul.f32 0.7978846, %v692_v13  ;;  %v723_v22 = vmul.f32 0.7978846, %v691_v10 }
 0x150   : > { %v1877_v30 = vpop.eup %1876  ;;  %v673_v60 = vadd.f32 %v641_v4, %v2354_v51  ;;  %v2528_v44 = vmul.f32 %v781_v21, %v2342_v40  ;;  %v706_v50 = vmul.f32 0.7978846, %v674_v25  ;;  %v2532_v55 = vmul.f32 0.044715, %v2487_v29  ;;  %v529_v21 = vpop.f32.mrf.mxu1 }
 0x151   : > { %v782_v45 = vadd.f32 1.0, %v1877_v30  ;;  %v690_v18 = vadd.f32 %v658_v28, %v2386_v6  ;;  %1884 = vtanh.f32 %v724_v31  ;;  %v625_v61 = vmul.f32 %v2383_v5, %v2357_v52 }
 0x152   : > { %869 = vadd.xlane.f32.xlu1 %v2521_v54  ;;  %v705_v15 = vmul.f32 0.7978846, %v673_v60  ;;  %v2537_v58 = vmul.f32 0.044715, %v2494_v26  ;;  %863 = vadd.xlane.f32.xlu0 %v2528_v44  ;;  %1886 = vtanh.f32 %v723_v22  ;;  %v2544_v0 = vmul.f32 0.044715, %v2497_v41 }
 0x153   : > { %v2541_v40 = vmul.f32 %v782_v45, %v2418_v27  ;;  %v722_v39 = vmul.f32 0.7978846, %v690_v18  ;;  %v1879_v19 = vpop.eup %1878  ;;  %1888 = vtanh.f32 %v706_v50  ;;  %v657_v11 = vmul.f32 %v625_v61, %v2357_v52 }
 0x154   : > { %v616_v5 = vmul.f32 %v2453_v2, %v2429_v37  ;;  %v2550_v13 = vmul.f32 0.044715, %v2510_v59  ;;  %v766_v27 = vadd.f32 1.0, %v1879_v19  ;;  %1890 = vtanh.f32 %v705_v15 }
 0x155   : > { %v615_v10 = vmul.f32 %v2412_v23, %v2389_v7  ;;  %v1881_v4 = vpop.eup %1880  ;;  %1892 = vtanh.f32 %v722_v39  ;;  %v689_v25 = vadd.f32 %v657_v11, %v2357_v52  ;;  %v632_v2 = vmul.f32 %v2456_v3, %v2432_v38 }
 0x156   : > { %865 = vadd.xlane.f32.xlu1 %v2541_v40  ;;  %v648_v28 = vmul.f32 %v616_v5, %v2429_v37  ;;  %v2560_v30 = vadd.f32 %v2319_v56, %v465_v1  ;;  %v2563_v31 = vmul.f32 %v766_v27, %v2459_v8  ;;  %v772_v22 = vadd.f32 1.0, %v1881_v4 }
 0x157   : > { %v647_v60 = vmul.f32 %v615_v10, %v2389_v7  ;;  %v721_v23 = vmul.f32 0.7978846, %v689_v25  ;;  %v664_v50 = vmul.f32 %v632_v2, %v2432_v38  ;;  %v631_v18 = vmul.f32 %v2423_v32, %v2395_v16 }
 0x158   : > { %v680_v45 = vadd.f32 %v648_v28, %v2429_v37  ;;  %v2571_v15 = vadd.f32 %v2319_v56, %v529_v21  ;;  %833 = vadd.xlane.f32.xlu0 %v2563_v31  ;;  %v2575_v3 = vmul.f32 %v772_v22, %v2462_v9  ;;  %v614_v61 = vmul.f32 %v2469_v14, %v2440_v47 }
 0x159   : > { %v679_v8 = vadd.f32 %v647_v60, %v2389_v7  ;;  %1894 = vtanh.f32 %v721_v23  ;;  %v696_v19 = vadd.f32 %v664_v50, %v2432_v38  ;;  %v663_v1 = vmul.f32 %v631_v18, %v2395_v16 }
 0x15a   : > { %v712_v39 = vmul.f32 0.7978846, %v680_v45  ;;  %v586_v32 = vmul.f32 0.044715, %v2560_v30  ;;  %845 = vadd.xlane.f32.xlu1 %v2575_v3  ;;  %v646_v11 = vmul.f32 %v614_v61, %v2440_v47  ;;  %v613_v9 = vmul.f32 %v2426_v36, %v2398_v17 }
 0x15b   : > { %v711_v56 = vmul.f32 0.7978846, %v679_v8  ;;  %v547_v5 = vmul.f32 0.5, %v2346_v42  ;;  %v728_v14 = vmul.f32 0.7978846, %v696_v19  ;;  %v695_v27 = vadd.f32 %v663_v1, %v2395_v16 }
 0x15c   : > { %1896 = vtanh.f32 %v712_v39  ;;  %v1883_v10 = vpop.eup %1882  ;;  %v678_v4 = vadd.f32 %v646_v11, %v2440_v47  ;;  %v645_v21 = vmul.f32 %v613_v9, %v2398_v17  ;;  %v630_v25 = vmul.f32 %v2472_v20, %v2443_v48 }
 0x15d   : > { %1898 = vtanh.f32 %v711_v56  ;;  %v771_v28 = vadd.f32 1.0, %v1883_v10  ;;  %v564_v2 = vmul.f32 0.5, %v2372_v62  ;;  %v727_v36 = vmul.f32 0.7978846, %v695_v27 }
 0x15e   : > { %1900 = vtanh.f32 %v728_v14  ;;  %v1885_v22 = vpop.eup %1884  ;;  %v710_v42 = vmul.f32 0.7978846, %v678_v4  ;;  %v677_v60 = vadd.f32 %v645_v21, %v2398_v17  ;;  %v662_v23 = vmul.f32 %v630_v25, %v2443_v48 }
 0x15f   : > { %v629_v45 = vmul.f32 %v2437_v46, %v2415_v24  ;;  %v1887_v50 = vpop.eup %1886  ;;  %v2598_v18 = vmul.f32 %v771_v28, %v547_v5  ;;  %v788_v8 = vadd.f32 1.0, %v1885_v22  ;;  %v563_v20 = vmul.f32 0.5, %v2349_v43 }
 0x160   : > { %1902 = vtanh.f32 %v727_v36  ;;  %v1889_v61 = vpop.eup %1888  ;;  %v787_v62 = vadd.f32 1.0, %v1887_v50  ;;  %v709_v39 = vmul.f32 0.7978846, %v677_v60  ;;  %v694_v19 = vadd.f32 %v662_v23, %v2443_v48 }
 0x161   : > { %1904 = vtanh.f32 %v710_v42  ;;  %v1891_v1 = vpop.eup %1890  ;;  %843 = vadd.xlane.f32.xlu0 %v2598_v18  ;;  %v2603_v56 = vmul.f32 %v788_v8, %v564_v2  ;;  %v770_v11 = vadd.f32 1.0, %v1889_v61  ;;  %v661_v46 = vmul.f32 %v629_v45, %v2415_v24 }
 0x162   : > { %v620_v9 = vmul.f32 %v2544_v0, %v2497_v41  ;;  %v1893_v5 = vpop.eup %1892  ;;  %v602_v43 = vmul.f32 0.044715, %v2571_v15  ;;  %v2609_v14 = vmul.f32 %v787_v62, %v563_v20  ;;  %v546_v27 = vmul.f32 0.5, %v2375_v63 }
 0x163   : > { %v726_v10 = vmul.f32 0.7978846, %v694_v19  ;;  %877 = vadd.xlane.f32.xlu1 %v2603_v56  ;;  %v769_v4 = vadd.f32 1.0, %v1891_v1  ;;  %1906 = vtanh.f32 %v709_v39  ;;  %v693_v21 = vadd.f32 %v661_v46, %v2415_v24 }
 0x164   : > { %v652_v25 = vmul.f32 %v620_v9, %v2497_v41  ;;  %v2615_v28 = vmul.f32 %v770_v11, %v546_v27  ;;  %v545_v0 = vmul.f32 0.5, %v2354_v51  ;;  %v562_v2 = vmul.f32 0.5, %v2386_v6 }
 0x165   : > { %v619_v36 = vmul.f32 %v2480_v35, %v2446_v49  ;;  %875 = vadd.xlane.f32.xlu0 %v2609_v14  ;;  %v786_v63 = vadd.f32 1.0, %v1893_v5  ;;  %1908 = vtanh.f32 %v726_v10  ;;  %v725_v22 = vmul.f32 0.7978846, %v693_v21 }
 0x166   : > { %v684_v42 = vadd.f32 %v652_v25, %v2497_v41  ;;  %v1895_v60 = vpop.eup %1894  ;;  %v561_v23 = vmul.f32 0.5, %v2357_v52  ;;  %v618_v50 = vmul.f32 %v586_v32, %v2560_v30  ;;  %v617_v51 = vmul.f32 %v2532_v55, %v2487_v29 }
 0x167   : > { %v651_v45 = vmul.f32 %v619_v36, %v2446_v49  ;;  %841 = vadd.xlane.f32.xlu1 %v2615_v28  ;;  %v2629_v6 = vmul.f32 %v769_v4, %v545_v0  ;;  %v785_v35 = vadd.f32 1.0, %v1895_v60  ;;  %1910 = vtanh.f32 %v725_v22 }
 0x168   : > { %v716_v8 = vmul.f32 0.7978846, %v684_v42  ;;  %v650_v62 = vmul.f32 %v618_v50, %v2560_v30  ;;  %v649_v52 = vmul.f32 %v617_v51, %v2487_v29  ;;  %v634_v39 = vmul.f32 %v602_v43, %v2571_v15 }
 0x169   : > { %v1897_v20 = vpop.eup %1896  ;;  %v683_v61 = vadd.f32 %v651_v45, %v2446_v49  ;;  %839 = vadd.xlane.f32.xlu0 %v2629_v6  ;;  %v2636_v55 = vmul.f32 %v786_v63, %v562_v2  ;;  %v552_v19 = vmul.f32 0.5, %v2429_v37  ;;  %v2642_v10 = vmul.f32 %v785_v35, %v561_v23 }
 0x16a   : > { %v1899_v32 = vpop.eup %1898  ;;  %v776_v1 = vadd.f32 1.0, %v1897_v20  ;;  %1912 = vtanh.f32 %v716_v8  ;;  %v682_v5 = vadd.f32 %v650_v62, %v2560_v30  ;;  %v681_v27 = vadd.f32 %v649_v52, %v2487_v29 }
 0x16b   : > { %v1901_v11 = vpop.eup %1900  ;;  %v775_v46 = vadd.f32 1.0, %v1899_v32  ;;  %v715_v9 = vmul.f32 0.7978846, %v683_v61  ;;  %873 = vadd.xlane.f32.xlu1 %v2636_v55  ;;  %v551_v43 = vmul.f32 0.5, %v2389_v7  ;;  %v666_v4 = vmul.f32 %v634_v39, %v2571_v15 }
 0x16c   : > { %v633_v37 = vmul.f32 %v2537_v58, %v2494_v26  ;;  %v792_v25 = vadd.f32 1.0, %v1901_v11  ;;  %v714_v0 = vmul.f32 0.7978846, %v682_v5  ;;  %v713_v2 = vmul.f32 0.7978846, %v681_v27 }
 0x16d   : > { %v1903_v21 = vpop.eup %1902  ;;  %1914 = vtanh.f32 %v715_v9  ;;  %v603_v63 = vmul.f32 0.044715, %v2475_v33  ;;  %871 = vadd.xlane.f32.xlu0 %v2642_v10  ;;  %v2650_v22 = vmul.f32 %v776_v1, %v552_v19  ;;  %v698_v42 = vadd.f32 %v666_v4, %v2571_v15 }
 0x16e   : > { %v1905_v36 = vpop.eup %1904  ;;  %v665_v7 = vmul.f32 %v633_v37, %v2494_v26  ;;  %v2654_v60 = vmul.f32 %v775_v46, %v551_v43  ;;  %v568_v58 = vmul.f32 0.5, %v2432_v38  ;;  %1916 = vtanh.f32 %v714_v0 }
 0x16f   : > { %v636_v23 = vmul.f32 %v2550_v13, %v2510_v59  ;;  %853 = vadd.xlane.f32.xlu1 %v2650_v22  ;;  %v791_v45 = vadd.f32 1.0, %v1903_v21  ;;  %1918 = vtanh.f32 %v713_v2  ;;  %v730_v50 = vmul.f32 0.7978846, %v698_v42 }
 0x170   : > { %v697_v51 = vadd.f32 %v665_v7, %v2494_v26  ;;  %v1907_v35 = vpop.eup %1906  ;;  %v2661_v8 = vmul.f32 %v792_v25, %v568_v58  ;;  %v567_v20 = vmul.f32 0.5, %v2395_v16  ;;  %v774_v38 = vadd.f32 1.0, %v1905_v36 }
 0x171   : > { %v668_v61 = vmul.f32 %v636_v23, %v2510_v59  ;;  %851 = vadd.xlane.f32.xlu0 %v2654_v60  ;;  %1920 = vtanh.f32 %v730_v50  ;;  %v635_v13 = vmul.f32 %v603_v63, %v2475_v33  ;;  %v550_v39 = vmul.f32 0.5, %v2440_v47 }
 0x172   : > { %v729_v62 = vmul.f32 0.7978846, %v697_v51  ;;  %v1909_v52 = vpop.eup %1908  ;;  %v2670_v19 = vmul.f32 %v791_v45, %v567_v20  ;;  %v773_v1 = vadd.f32 1.0, %v1907_v35  ;;  %v549_v5 = vmul.f32 0.5, %v2398_v17 }
 0x173   : > { %v700_v32 = vadd.f32 %v668_v61, %v2510_v59  ;;  %885 = vadd.xlane.f32.xlu1 %v2661_v8  ;;  %v667_v16 = vmul.f32 %v635_v13, %v2475_v33  ;;  %v2674_v9 = vmul.f32 %v774_v38, %v550_v39  ;;  %v790_v27 = vadd.f32 1.0, %v1909_v52 }
 0x174   : > { %1922 = vtanh.f32 %v729_v62  ;;  %v1911_v11 = vpop.eup %1910  ;;  %v2679_v4 = vmul.f32 %v773_v1, %v549_v5  ;;  %v566_v37 = vmul.f32 0.5, %v2443_v48  ;;  %v565_v17 = vmul.f32 0.5, %v2415_v24 }
 0x175   : > { %v732_v46 = vmul.f32 0.7978846, %v700_v32  ;;  %883 = vadd.xlane.f32.xlu0 %v2670_v19  ;;  %v699_v47 = vadd.f32 %v667_v16, %v2475_v33  ;;  %v789_v21 = vadd.f32 1.0, %v1911_v11  ;;  %v556_v7 = vmul.f32 0.5, %v2497_v41 }
 0x176   : > { %v2683_v2 = vmul.f32 %v790_v27, %v566_v37  ;;  %v555_v48 = vmul.f32 0.5, %v2446_v49  ;;  %v554_v35 = vmul.f32 0.5, %v2560_v30  ;;  %v553_v49 = vmul.f32 0.5, %v2487_v29 }
 0x177   : > { %v1913_v43 = vpop.eup %1912  ;;  %1924 = vtanh.f32 %v732_v46  ;;  %849 = vadd.xlane.f32.xlu1 %v2674_v9  ;;  %v731_v25 = vmul.f32 0.7978846, %v699_v47  ;;  %v2687_v42 = vmul.f32 %v789_v21, %v565_v17  ;;  %v570_v38 = vmul.f32 0.5, %v2571_v15 }
 0x178   : > { %v780_v36 = vadd.f32 1.0, %v1913_v43  ;;  %v569_v39 = vmul.f32 0.5, %v2494_v26  ;;  %v572_v1 = vmul.f32 0.5, %v2510_v59  ;;  %v571_v15 = vmul.f32 0.5, %v2475_v33 }
 0x179   : > { %847 = vadd.xlane.f32.xlu0 %v2679_v4  ;;  %1926 = vtanh.f32 %v731_v25 }
 0x17a   : > { %v1915_v0 = vpop.eup %1914  ;;  %v2692_v45 = vmul.f32 %v780_v36, %v556_v7 }
 0x17b   : > { %v1917_v63 = vpop.eup %1916  ;;  %881 = vadd.xlane.f32.xlu1 %v2683_v2  ;;  %v779_v58 = vadd.f32 1.0, %v1915_v0 }
 0x17c   : > { %v1919_v23 = vpop.eup %1918  ;;  %v778_v50 = vadd.f32 1.0, %v1917_v63 }
 0x17d   : > { %879 = vadd.xlane.f32.xlu0 %v2687_v42  ;;  %v2695_v24 = vmul.f32 %v779_v58, %v555_v48  ;;  %v777_v20 = vadd.f32 1.0, %v1919_v23 }
 0x17e   : > { %v1921_v51 = vpop.eup %1920  ;;  %v2699_v41 = vmul.f32 %v778_v50, %v554_v35 }
 0x17f   : > { %861 = vadd.xlane.f32.xlu1 %v2692_v45  ;;  %v794_v62 = vadd.f32 1.0, %v1921_v51  ;;  %v2704_v52 = vmul.f32 %v777_v20, %v553_v49 }
 0x181   : > { %v1923_v61 = vpop.eup %1922  ;;  %859 = vadd.xlane.f32.xlu0 %v2695_v24  ;;  %v2708_v30 = vmul.f32 %v794_v62, %v570_v38 }
 0x182   : > { %v793_v32 = vadd.f32 1.0, %v1923_v61 }
 0x183   : > { %857 = vadd.xlane.f32.xlu1 %v2699_v41 }
 0x184   : > { %v1925_v13 = vpop.eup %1924  ;;  %v2712_v29 = vmul.f32 %v793_v32, %v569_v39 }
 0x185   : > { %855 = vadd.xlane.f32.xlu0 %v2704_v52  ;;  %v796_v16 = vadd.f32 1.0, %v1925_v13 }
 0x186   : > { %v1927_v11 = vpop.eup %1926 }
 0x187   : > { %889 = vadd.xlane.f32.xlu1 %v2708_v30  ;;  %v795_v46 = vadd.f32 1.0, %v1927_v11  ;;  %v2716_v5 = vmul.f32 %v796_v16, %v572_v1 }
 0x189   : > { %887 = vadd.xlane.f32.xlu0 %v2712_v29  ;;  %v2719_v26 = vmul.f32 %v795_v46, %v571_v15 }
 0x18b   : > { %893 = vadd.xlane.f32.xlu1 %v2716_v5 }
 0x18d   : > { %891 = vadd.xlane.f32.xlu0 %v2719_v26 }
 0x1d2   : > { %v868_v59 = vpop.xlane.xlu0 %867 }
 0x1d3   : > { %v836_v27 = vpop.xlane.xlu1 %835  ;;  %v914_v47 = vmul.f32 0.0078125, %v868_v59 }
 0x1d4   : > { %v898_v43 = vmul.f32 0.0078125, %v836_v27 }
 0x1d5   : > { %v2726_v25 = vsub.f32 %v2449_v57, %v914_v47 }
 0x1d6   : > { %v2723_v37 = vsub.f32 %v2466_v34, %v898_v43 }
 0x1d7   : > { %v838_v21 = vpop.xlane.xlu1 %837  ;;  %v832_v33 = vpop.xlane.xlu0 %831  ;;  %v978_v57 = vmul.f32 %v2726_v25, %v2726_v25 }
 0x1d8   : > { %v899_v0 = vmul.f32 0.0078125, %v838_v21  ;;  %v896_v17 = vmul.f32 0.0078125, %v832_v33  ;;  %v962_v36 = vmul.f32 %v2723_v37, %v2723_v37 }
 0x1da   : > { %v2731_v63 = vsub.f32 %v2484_v12, %v899_v0  ;;  %996 = vadd.xlane.f32.xlu0 %v962_v36  ;;  %v2734_v48 = vsub.f32 %v2500_v53, %v896_v17 }
 0x1db   : > { %v870_v7 = vpop.xlane.xlu1 %869  ;;  %v864_v23 = vpop.xlane.xlu0 %863 }
 0x1dc   : > { %v915_v34 = vmul.f32 0.0078125, %v870_v7  ;;  %v963_v58 = vmul.f32 %v2731_v63, %v2731_v63  ;;  %v912_v51 = vmul.f32 0.0078125, %v864_v23  ;;  %v960_v20 = vmul.f32 %v2734_v48, %v2734_v48 }
 0x1de   : > { %v2741_v50 = vsub.f32 %v2521_v54, %v915_v34  ;;  %998 = vadd.xlane.f32.xlu1 %v963_v58  ;;  %1028 = vadd.xlane.f32.xlu0 %v978_v57  ;;  %v2744_v35 = vsub.f32 %v2528_v44, %v912_v51 }
 0x1df   : > { %v866_v12 = vpop.xlane.xlu1 %865 }
 0x1e0   : > { %v979_v53 = vmul.f32 %v2741_v50, %v2741_v50  ;;  %v913_v49 = vmul.f32 0.0078125, %v866_v12  ;;  %v976_v54 = vmul.f32 %v2744_v35, %v2744_v35 }
 0x1e1   : > { %v834_v61 = vpop.xlane.xlu0 %833 }
 0x1e2   : > { %1030 = vadd.xlane.f32.xlu1 %v979_v53  ;;  %992 = vadd.xlane.f32.xlu0 %v960_v20  ;;  %v897_v38 = vmul.f32 0.0078125, %v834_v61  ;;  %v2756_v44 = vsub.f32 %v2541_v40, %v913_v49 }
 0x1e3   : > { %v846_v62 = vpop.xlane.xlu1 %845 }
 0x1e4   : > { %v2753_v13 = vsub.f32 %v2563_v31, %v897_v38  ;;  %v903_v39 = vmul.f32 0.0078125, %v846_v62  ;;  %v977_v11 = vmul.f32 %v2756_v44, %v2756_v44 }
 0x1e6   : > { %1024 = vadd.xlane.f32.xlu0 %v976_v54  ;;  %v961_v32 = vmul.f32 %v2753_v13, %v2753_v13  ;;  %v2761_v1 = vsub.f32 %v2575_v3, %v903_v39 }
 0x1e8   : > { %994 = vadd.xlane.f32.xlu1 %v961_v32  ;;  %v967_v27 = vmul.f32 %v2761_v1, %v2761_v1 }
 0x1ea   : > { %v844_v16 = vpop.xlane.xlu0 %843 }
 0x1eb   : > { %v902_v15 = vmul.f32 0.0078125, %v844_v16 }
 0x1ec   : > { %v878_v46 = vpop.xlane.xlu1 %877  ;;  %1026 = vadd.xlane.f32.xlu1 %v977_v11 }
 0x1ed   : > { %v2766_v31 = vsub.f32 %v2598_v18, %v902_v15  ;;  %v919_v40 = vmul.f32 0.0078125, %v878_v46 }
 0x1ee   : > { %v876_v59 = vpop.xlane.xlu0 %875 }
 0x1ef   : > { %v2771_v47 = vsub.f32 %v2603_v56, %v919_v40  ;;  %v918_v3 = vmul.f32 0.0078125, %v876_v59  ;;  %v966_v43 = vmul.f32 %v2766_v31, %v2766_v31 }
 0x1f0   : > { %v842_v21 = vpop.xlane.xlu1 %841  ;;  %1006 = vadd.xlane.f32.xlu1 %v967_v27 }
 0x1f1   : > { %v2776_v33 = vsub.f32 %v2609_v14, %v918_v3  ;;  %1004 = vadd.xlane.f32.xlu0 %v966_v43  ;;  %v901_v18 = vmul.f32 0.0078125, %v842_v21  ;;  %v983_v17 = vmul.f32 %v2771_v47, %v2771_v47 }
 0x1f2   : > { %v840_v0 = vpop.xlane.xlu0 %839 }
 0x1f3   : > { %v2781_v36 = vsub.f32 %v2615_v28, %v901_v18  ;;  %v900_v56 = vmul.f32 0.0078125, %v840_v0  ;;  %v982_v7 = vmul.f32 %v2776_v33, %v2776_v33 }
 0x1f4   : > { %v874_v34 = vpop.xlane.xlu1 %873  ;;  %1038 = vadd.xlane.f32.xlu1 %v983_v17 }
 0x1f5   : > { %v2786_v58 = vsub.f32 %v2629_v6, %v900_v56  ;;  %1036 = vadd.xlane.f32.xlu0 %v982_v7  ;;  %v917_v14 = vmul.f32 0.0078125, %v874_v34  ;;  %v965_v23 = vmul.f32 %v2781_v36, %v2781_v36 }
 0x1f6   : > { %v872_v57 = vpop.xlane.xlu0 %871 }
 0x1f7   : > { %v2791_v51 = vsub.f32 %v2636_v55, %v917_v14  ;;  %v916_v28 = vmul.f32 0.0078125, %v872_v57  ;;  %v964_v12 = vmul.f32 %v2786_v58, %v2786_v58 }
 0x1f8   : > { %v854_v53 = vpop.xlane.xlu1 %853  ;;  %1002 = vadd.xlane.f32.xlu1 %v965_v23 }
 0x1f9   : > { %v2796_v20 = vsub.f32 %v2642_v10, %v916_v28  ;;  %1000 = vadd.xlane.f32.xlu0 %v964_v12  ;;  %v907_v6 = vmul.f32 0.0078125, %v854_v53  ;;  %v981_v49 = vmul.f32 %v2791_v51, %v2791_v51 }
 0x1fa   : > { %v852_v61 = vpop.xlane.xlu0 %851 }
 0x1fb   : > { %v2801_v38 = vsub.f32 %v2650_v22, %v907_v6  ;;  %v906_v55 = vmul.f32 0.0078125, %v852_v61  ;;  %v980_v54 = vmul.f32 %v2796_v20, %v2796_v20 }
 0x1fc   : > { %v886_v62 = vpop.xlane.xlu1 %885  ;;  %1034 = vadd.xlane.f32.xlu1 %v981_v49 }
 0x1fd   : > { %v2806_v39 = vsub.f32 %v2654_v60, %v906_v55  ;;  %1032 = vadd.xlane.f32.xlu0 %v980_v54  ;;  %v923_v10 = vmul.f32 0.0078125, %v886_v62  ;;  %v971_v16 = vmul.f32 %v2801_v38, %v2801_v38 }
 0x1fe   : > { %v884_v32 = vpop.xlane.xlu0 %883 }
 0x1ff   : > { %v2811_v11 = vsub.f32 %v2661_v8, %v923_v10  ;;  %v922_v22 = vmul.f32 0.0078125, %v884_v32  ;;  %v970_v15 = vmul.f32 %v2806_v39, %v2806_v39 }
 0x200   : > { %v850_v46 = vpop.xlane.xlu1 %849  ;;  %1014 = vadd.xlane.f32.xlu1 %v971_v16 }
 0x201   : > { %v2816_v40 = vsub.f32 %v2670_v19, %v922_v22  ;;  %1012 = vadd.xlane.f32.xlu0 %v970_v15  ;;  %v905_v60 = vmul.f32 0.0078125, %v850_v46  ;;  %v987_v27 = vmul.f32 %v2811_v11, %v2811_v11 }
 0x202   : > { %v848_v59 = vpop.xlane.xlu0 %847 }
 0x203   : > { %v2821_v3 = vsub.f32 %v2674_v9, %v905_v60  ;;  %v904_v8 = vmul.f32 0.0078125, %v848_v59  ;;  %v986_v43 = vmul.f32 %v2816_v40, %v2816_v40 }
 0x204   : > { %v882_v21 = vpop.xlane.xlu1 %881  ;;  %1046 = vadd.xlane.f32.xlu1 %v987_v27 }
 0x205   : > { %v2826_v18 = vsub.f32 %v2679_v4, %v904_v8  ;;  %1044 = vadd.xlane.f32.xlu0 %v986_v43  ;;  %v921_v19 = vmul.f32 0.0078125, %v882_v21  ;;  %v969_v17 = vmul.f32 %v2821_v3, %v2821_v3 }
 0x206   : > { %v880_v0 = vpop.xlane.xlu0 %879 }
 0x207   : > { %v2831_v56 = vsub.f32 %v2683_v2, %v921_v19  ;;  %v920_v9 = vmul.f32 0.0078125, %v880_v0  ;;  %v968_v7 = vmul.f32 %v2826_v18, %v2826_v18 }
 0x208   : > { %v862_v34 = vpop.xlane.xlu1 %861  ;;  %1010 = vadd.xlane.f32.xlu1 %v969_v17 }
 0x209   : > { %v2836_v14 = vsub.f32 %v2687_v42, %v920_v9  ;;  %1008 = vadd.xlane.f32.xlu0 %v968_v7  ;;  %v911_v4 = vmul.f32 0.0078125, %v862_v34  ;;  %v985_v23 = vmul.f32 %v2831_v56, %v2831_v56 }
 0x20a   : > { %v860_v57 = vpop.xlane.xlu0 %859 }
 0x20b   : > { %v2841_v28 = vsub.f32 %v2692_v45, %v911_v4  ;;  %v910_v2 = vmul.f32 0.0078125, %v860_v57  ;;  %v984_v12 = vmul.f32 %v2836_v14, %v2836_v14 }
 0x20c   : > { %v858_v53 = vpop.xlane.xlu1 %857  ;;  %1042 = vadd.xlane.f32.xlu1 %v985_v23 }
 0x20d   : > { %v2846_v6 = vsub.f32 %v2695_v24, %v910_v2  ;;  %1040 = vadd.xlane.f32.xlu0 %v984_v12  ;;  %v909_v42 = vmul.f32 0.0078125, %v858_v53  ;;  %v975_v49 = vmul.f32 %v2841_v28, %v2841_v28 }
 0x20e   : > { %v856_v61 = vpop.xlane.xlu0 %855 }
 0x20f   : > { %v2851_v55 = vsub.f32 %v2699_v41, %v909_v42  ;;  %v908_v45 = vmul.f32 0.0078125, %v856_v61  ;;  %v974_v54 = vmul.f32 %v2846_v6, %v2846_v6 }
 0x210   : > { %v890_v62 = vpop.xlane.xlu1 %889  ;;  %1022 = vadd.xlane.f32.xlu1 %v975_v49 }
 0x211   : > { %v2856_v10 = vsub.f32 %v2704_v52, %v908_v45  ;;  %1020 = vadd.xlane.f32.xlu0 %v974_v54  ;;  %v925_v24 = vmul.f32 0.0078125, %v890_v62  ;;  %v973_v16 = vmul.f32 %v2851_v55, %v2851_v55 }
 0x212   : > { %v888_v32 = vpop.xlane.xlu0 %887 }
 0x213   : > { %v2861_v22 = vsub.f32 %v2708_v30, %v925_v24  ;;  %v924_v41 = vmul.f32 0.0078125, %v888_v32  ;;  %v972_v15 = vmul.f32 %v2856_v10, %v2856_v10 }
 0x214   : > { %v894_v46 = vpop.xlane.xlu1 %893  ;;  %1018 = vadd.xlane.f32.xlu1 %v973_v16  ;;  %v2885_v16 = vld [vmem:[%s3059_s3] ss:$0 sm:$0xff] }
 0x215   : > { %v2866_v60 = vsub.f32 %v2712_v29, %v924_v41  ;;  %1016 = vadd.xlane.f32.xlu0 %v972_v15  ;;  %v927_v52 = vmul.f32 0.0078125, %v894_v46  ;;  %v989_v27 = vmul.f32 %v2861_v22, %v2861_v22 }
 0x216   : > { %v892_v59 = vpop.xlane.xlu0 %891 }
 0x217   : > { %v2871_v8 = vsub.f32 %v2716_v5, %v927_v52  ;;  %v926_v30 = vmul.f32 0.0078125, %v892_v59  ;;  %v988_v43 = vmul.f32 %v2866_v60, %v2866_v60 }
 0x218   : > { %1050 = vadd.xlane.f32.xlu1 %v989_v27 }
 0x219   : > { %v2876_v21 = vsub.f32 %v2719_v26, %v926_v30  ;;  %1048 = vadd.xlane.f32.xlu0 %v988_v43  ;;  %v991_v29 = vmul.f32 %v2871_v8, %v2871_v8  ;;  %v2892_v43 = vld [vmem:[%s3060_s4] ss:$0 sm:$0xff] }
 0x21b   : > { %v990_v19 = vmul.f32 %v2876_v21, %v2876_v21 }
 0x21c   : > { %1054 = vadd.xlane.f32.xlu1 %v991_v29 }
 0x21d   : > { %1052 = vadd.xlane.f32.xlu0 %v990_v19 }
 0x263   : > { %v997_v0 = vpop.xlane.xlu0 %996 }
 0x264   : > { %v1058_v5 = vmul.f32 0.0078125, %v997_v0 }
 0x266   : > { %v1090_v17 = vadd.f32 1e-12, %v1058_v5 }
 0x267   : > { %v999_v9 = vpop.xlane.xlu1 %998  ;;  %v1029_v7 = vpop.xlane.xlu0 %1028 }
 0x268   : > { %1928 = vrsqrt.f32 %v1090_v17  ;;  %v1059_v34 = vmul.f32 0.0078125, %v999_v9  ;;  %v1074_v4 = vmul.f32 0.0078125, %v1029_v7 }
 0x26a   : > { %v1091_v57 = vadd.f32 1e-12, %v1059_v34  ;;  %v1106_v26 = vadd.f32 1e-12, %v1074_v4 }
 0x26b   : > { %v1031_v23 = vpop.xlane.xlu1 %1030  ;;  %v993_v2 = vpop.xlane.xlu0 %992 }
 0x26c   : > { %1930 = vrsqrt.f32 %v1091_v57  ;;  %v1075_v12 = vmul.f32 0.0078125, %v1031_v23  ;;  %v1056_v53 = vmul.f32 0.0078125, %v993_v2 }
 0x26d   : > { %1932 = vrsqrt.f32 %v1106_v26 }
 0x26e   : > { %v1107_v42 = vadd.f32 1e-12, %v1075_v12  ;;  %v1088_v61 = vadd.f32 1e-12, %v1056_v53 }
 0x26f   : > { %v1025_v49 = vpop.xlane.xlu0 %1024 }
 0x270   : > { %1934 = vrsqrt.f32 %v1107_v42  ;;  %v1072_v45 = vmul.f32 0.0078125, %v1025_v49 }
 0x271   : > { %1936 = vrsqrt.f32 %v1088_v61  ;;  %v995_v62 = vpop.xlane.xlu1 %994 }
 0x272   : > { %v1104_v54 = vadd.f32 1e-12, %v1072_v45  ;;  %v1057_v24 = vmul.f32 0.0078125, %v995_v62 }
 0x274   : > { %v1089_v15 = vadd.f32 1e-12, %v1057_v24  ;;  %1938 = vrsqrt.f32 %v1104_v54 }
 0x275   : > { %v1929_v32 = vpop.eup %1928  ;;  %v1027_v46 = vpop.xlane.xlu1 %1026 }
 0x276   : > { %v1154_v41 = vmul.f32 %v1929_v32, %v2723_v37  ;;  %1940 = vrsqrt.f32 %v1089_v15  ;;  %v1073_v52 = vmul.f32 0.0078125, %v1027_v46 }
 0x278   : > { %v1192_v27 = vmul.f32 %v2885_v16, %v1154_v41  ;;  %v1105_v19 = vadd.f32 1e-12, %v1073_v52 }
 0x279   : > { %v1931_v59 = vpop.eup %1930  ;;  %v1007_v37 = vpop.xlane.xlu1 %1006 }
 0x27a   : > { %v1933_v30 = vpop.eup %1932  ;;  %v1155_v29 = vmul.f32 %v1931_v59, %v2731_v63  ;;  %1942 = vrsqrt.f32 %v1105_v19  ;;  %v1005_v17 = vpop.xlane.xlu0 %1004  ;;  %v1063_v9 = vmul.f32 0.0078125, %v1007_v37  ;;  %v1230_v34 = vadd.f32 %v2892_v43, %v1192_v27 }
 0x27b   : > { %v1170_v0 = vmul.f32 %v1933_v30, %v2726_v25  ;;  %v1062_v4 = vmul.f32 0.0078125, %v1005_v17 }
 0x27c   : > { %v1193_v5 = vmul.f32 %v2885_v16, %v1155_v29  ;;  %v1095_v2 = vadd.f32 1e-12, %v1063_v9 }
 0x27d   : > { %v1935_v7 = vpop.eup %1934  ;;  %v1208_v23 = vmul.f32 %v2885_v16, %v1170_v0  ;;  %v1094_v25 = vadd.f32 1e-12, %v1062_v4  ;;  %v1039_v12 = vpop.xlane.xlu1 %1038 }
 0x27e   : > { %v1937_v57 = vpop.eup %1936  ;;  %v1231_v26 = vadd.f32 %v2892_v43, %v1193_v5  ;;  %v1171_v63 = vmul.f32 %v1935_v7, %v2741_v50  ;;  %1944 = vrsqrt.f32 %v1095_v2  ;;  %v1037_v61 = vpop.xlane.xlu0 %1036  ;;  %v1079_v49 = vmul.f32 0.0078125, %v1039_v12 }
 0x27f   : > { %v1152_v45 = vmul.f32 %v1937_v57, %v2734_v48  ;;  %1946 = vrsqrt.f32 %v1094_v25  ;;  %v1078_v54 = vmul.f32 0.0078125, %v1037_v61  ;;  %v1246_v50 = vadd.f32 %v2892_v43, %v1208_v23 }
 0x280   : > { %v1618_v53 = vpack.c.bf16 %v1231_v26, %v1230_v34  ;;  %v1209_v42 = vmul.f32 %v2885_v16, %v1171_v63  ;;  %v1111_v24 = vadd.f32 1e-12, %v1079_v49 }
 0x281   : > { %v1939_v32 = vpop.eup %1938  ;;  %v1110_v41 = vadd.f32 1e-12, %v1078_v54  ;;  %v1003_v15 = vpop.xlane.xlu1 %1002  ;;  %v1190_v27 = vmul.f32 %v2885_v16, %v1152_v45 }
 0x282   : > { %1690 = vst [vmem:[%s2904_s23 + $0x8] sm:$0xff] %v1618_v53   ;;  %v1247_v62 = vadd.f32 %v2892_v43, %v1209_v42  ;;  %1948 = vrsqrt.f32 %v1111_v24  ;;  %v1001_v52 = vpop.xlane.xlu0 %1000  ;;  %v1061_v59 = vmul.f32 0.0078125, %v1003_v15  ;;  %v1168_v19 = vmul.f32 %v1939_v32, %v2744_v35 }
 0x283   : > { %v1941_v48 = vpop.eup %1940  ;;  %1950 = vrsqrt.f32 %v1110_v41  ;;  %v1060_v30 = vmul.f32 0.0078125, %v1001_v52  ;;  %v1228_v4 = vadd.f32 %v2892_v43, %v1190_v27 }
 0x284   : > { %v1658_v46 = vpack.c.bf16 %v1247_v62, %v1246_v50  ;;  %v1153_v29 = vmul.f32 %v1941_v48, %v2753_v13  ;;  %v1093_v0 = vadd.f32 1e-12, %v1061_v59  ;;  %v1206_v13 = vmul.f32 %v2885_v16, %v1168_v19 }
 0x285   : > { %v1092_v37 = vadd.f32 1e-12, %v1060_v30  ;;  %v1035_v5 = vpop.xlane.xlu1 %1034 }
 0x286   : > { %1698 = vst [vmem:[%s2904_s23 + $0x48] sm:$0xff] %v1658_v46   ;;  %v1191_v17 = vmul.f32 %v2885_v16, %v1153_v29  ;;  %1952 = vrsqrt.f32 %v1093_v0  ;;  %v1033_v9 = vpop.xlane.xlu0 %1032  ;;  %v1077_v7 = vmul.f32 0.0078125, %v1035_v5  ;;  %v1244_v54 = vadd.f32 %v2892_v43, %v1206_v13 }
 0x287   : > { %v1943_v34 = vpop.eup %1942  ;;  %1954 = vrsqrt.f32 %v1092_v37  ;;  %v1076_v57 = vmul.f32 0.0078125, %v1033_v9 }
 0x288   : > { %v1229_v26 = vadd.f32 %v2892_v43, %v1191_v17  ;;  %v1169_v35 = vmul.f32 %v1943_v34, %v2756_v44  ;;  %v1109_v23 = vadd.f32 1e-12, %v1077_v7 }
 0x289   : > { %v1108_v63 = vadd.f32 1e-12, %v1076_v57  ;;  %v1015_v2 = vpop.xlane.xlu1 %1014 }
 0x28a   : > { %v1613_v25 = vpack.c.bf16 %v1229_v26, %v1228_v4  ;;  %v1207_v12 = vmul.f32 %v2885_v16, %v1169_v35  ;;  %1956 = vrsqrt.f32 %v1109_v23  ;;  %v1013_v53 = vpop.xlane.xlu0 %1012  ;;  %v1067_v42 = vmul.f32 0.0078125, %v1015_v2 }
 0x28b   : > { %v1945_v61 = vpop.eup %1944  ;;  %1958 = vrsqrt.f32 %v1108_v63  ;;  %v1066_v49 = vmul.f32 0.0078125, %v1013_v53 }
 0x28c   : > { %v1947_v45 = vpop.eup %1946  ;;  %1614 = vst [vmem:[%s2904_s23] sm:$0xff] %v1613_v25   ;;  %v1245_v50 = vadd.f32 %v2892_v43, %v1207_v12  ;;  %v1159_v44 = vmul.f32 %v1945_v61, %v2761_v1  ;;  %v1099_v62 = vadd.f32 1e-12, %v1067_v42 }
 0x28d   : > { %v1158_v24 = vmul.f32 %v1947_v45, %v2766_v31  ;;  %v1098_v32 = vadd.f32 1e-12, %v1066_v49  ;;  %v1047_v41 = vpop.xlane.xlu1 %1046 }
 0x28e   : > { %v1653_v15 = vpack.c.bf16 %v1245_v50, %v1244_v54  ;;  %v1197_v46 = vmul.f32 %v2885_v16, %v1159_v44  ;;  %1960 = vrsqrt.f32 %v1099_v62  ;;  %v1045_v52 = vpop.xlane.xlu0 %1044  ;;  %v1083_v59 = vmul.f32 0.0078125, %v1047_v41 }
 0x28f   : > { %v1949_v48 = vpop.eup %1948  ;;  %v1196_v27 = vmul.f32 %v2885_v16, %v1158_v24  ;;  %1962 = vrsqrt.f32 %v1098_v32  ;;  %v1082_v30 = vmul.f32 0.0078125, %v1045_v52 }
 0x290   : > { %v1951_v29 = vpop.eup %1950  ;;  %1697 = vst [vmem:[%s2904_s23 + $0x40] sm:$0xff] %v1653_v15   ;;  %v1235_v1 = vadd.f32 %v2892_v43, %v1197_v46  ;;  %v1175_v19 = vmul.f32 %v1949_v48, %v2771_v47  ;;  %v1115_v31 = vadd.f32 1e-12, %v1083_v59 }
 0x291   : > { %v1234_v0 = vadd.f32 %v2892_v43, %v1196_v27  ;;  %v1174_v37 = vmul.f32 %v1951_v29, %v2776_v33  ;;  %v1114_v5 = vadd.f32 1e-12, %v1082_v30  ;;  %v1011_v17 = vpop.xlane.xlu1 %1010 }
 0x292   : > { %v1213_v9 = vmul.f32 %v2885_v16, %v1175_v19  ;;  %1964 = vrsqrt.f32 %v1115_v31  ;;  %v1009_v7 = vpop.xlane.xlu0 %1008  ;;  %v1065_v34 = vmul.f32 0.0078125, %v1011_v17 }
 0x293   : > { %v1953_v4 = vpop.eup %1952  ;;  %v1628_v57 = vpack.c.bf16 %v1235_v1, %v1234_v0  ;;  %v1212_v26 = vmul.f32 %v2885_v16, %v1174_v37  ;;  %1966 = vrsqrt.f32 %v1114_v5  ;;  %v1064_v13 = vmul.f32 0.0078125, %v1009_v7 }
 0x294   : > { %v1955_v47 = vpop.eup %1954  ;;  %v1251_v35 = vadd.f32 %v2892_v43, %v1213_v9  ;;  %v1157_v23 = vmul.f32 %v1953_v4, %v2781_v36  ;;  %v1097_v33 = vadd.f32 1e-12, %v1065_v34 }
 0x295   : > { %1692 = vst [vmem:[%s2904_s23 + $0x18] sm:$0xff] %v1628_v57   ;;  %v1250_v63 = vadd.f32 %v2892_v43, %v1212_v26  ;;  %v1156_v2 = vmul.f32 %v1955_v47, %v2786_v58  ;;  %v1096_v25 = vadd.f32 1e-12, %v1064_v13  ;;  %v1043_v12 = vpop.xlane.xlu1 %1042 }
 0x296   : > { %v1195_v53 = vmul.f32 %v2885_v16, %v1157_v23  ;;  %1968 = vrsqrt.f32 %v1097_v33  ;;  %v1041_v42 = vpop.xlane.xlu0 %1040  ;;  %v1081_v61 = vmul.f32 0.0078125, %v1043_v12 }
 0x297   : > { %v1957_v49 = vpop.eup %1956  ;;  %v1668_v45 = vpack.c.bf16 %v1251_v35, %v1250_v63  ;;  %v1194_v54 = vmul.f32 %v2885_v16, %v1156_v2  ;;  %1970 = vrsqrt.f32 %v1096_v25  ;;  %v1080_v36 = vmul.f32 0.0078125, %v1041_v42 }
 0x298   : > { %v1959_v50 = vpop.eup %1958  ;;  %v1233_v44 = vadd.f32 %v2892_v43, %v1195_v53  ;;  %v1173_v62 = vmul.f32 %v1957_v49, %v2791_v51  ;;  %v1113_v58 = vadd.f32 1e-12, %v1081_v61 }
 0x299   : > { %1700 = vst [vmem:[%s2904_s23 + $0x58] sm:$0xff] %v1668_v45   ;;  %v1232_v24 = vadd.f32 %v2892_v43, %v1194_v54  ;;  %v1172_v32 = vmul.f32 %v1959_v50, %v2796_v20  ;;  %v1112_v41 = vadd.f32 1e-12, %v1080_v36  ;;  %v1023_v15 = vpop.xlane.xlu1 %1022 }
 0x29a   : > { %v1211_v46 = vmul.f32 %v2885_v16, %v1173_v62  ;;  %1972 = vrsqrt.f32 %v1113_v58  ;;  %v1021_v52 = vpop.xlane.xlu0 %1020  ;;  %v1071_v59 = vmul.f32 0.0078125, %v1023_v15 }
 0x29b   : > { %v1961_v48 = vpop.eup %1960  ;;  %v1623_v27 = vpack.c.bf16 %v1233_v44, %v1232_v24  ;;  %v1210_v30 = vmul.f32 %v2885_v16, %v1172_v32  ;;  %1974 = vrsqrt.f32 %v1112_v41  ;;  %v1070_v51 = vmul.f32 0.0078125, %v1021_v52 }
 0x29c   : > { %v1963_v29 = vpop.eup %1962  ;;  %v1249_v1 = vadd.f32 %v2892_v43, %v1211_v46  ;;  %v1163_v19 = vmul.f32 %v1961_v48, %v2801_v38  ;;  %v1103_v20 = vadd.f32 1e-12, %v1071_v59 }
 0x29d   : > { %1691 = vst [vmem:[%s2904_s23 + $0x10] sm:$0xff] %v1623_v27   ;;  %v1248_v31 = vadd.f32 %v2892_v43, %v1210_v30  ;;  %v1162_v0 = vmul.f32 %v1963_v29, %v2806_v39  ;;  %v1102_v37 = vadd.f32 1e-12, %v1070_v51  ;;  %v1019_v5 = vpop.xlane.xlu1 %1018 }
 0x29e   : > { %v1201_v17 = vmul.f32 %v2885_v16, %v1163_v19  ;;  %1976 = vrsqrt.f32 %v1103_v20  ;;  %v1017_v9 = vpop.xlane.xlu0 %1016  ;;  %v1069_v7 = vmul.f32 0.0078125, %v1019_v5 }
 0x29f   : > { %v1965_v34 = vpop.eup %1964  ;;  %v1663_v4 = vpack.c.bf16 %v1249_v1, %v1248_v31  ;;  %v1200_v57 = vmul.f32 %v2885_v16, %v1162_v0  ;;  %1978 = vrsqrt.f32 %v1102_v37  ;;  %v1068_v38 = vmul.f32 0.0078125, %v1017_v9 }
 0x2a0   : > { %v1967_v26 = vpop.eup %1966  ;;  %v1239_v13 = vadd.f32 %v2892_v43, %v1201_v17  ;;  %v1179_v47 = vmul.f32 %v1965_v34, %v2811_v11  ;;  %v1101_v39 = vadd.f32 1e-12, %v1069_v7 }
 0x2a1   : > { %1699 = vst [vmem:[%s2904_s23 + $0x50] sm:$0xff] %v1663_v4   ;;  %v1238_v35 = vadd.f32 %v2892_v43, %v1200_v57  ;;  %v1178_v23 = vmul.f32 %v1967_v26, %v2816_v40  ;;  %v1100_v33 = vadd.f32 1e-12, %v1068_v38  ;;  %v1051_v63 = vpop.xlane.xlu1 %1050 }
 0x2a2   : > { %v1217_v2 = vmul.f32 %v2885_v16, %v1179_v47  ;;  %1980 = vrsqrt.f32 %v1101_v39  ;;  %v1049_v25 = vpop.xlane.xlu0 %1048  ;;  %v1085_v12 = vmul.f32 0.0078125, %v1051_v63 }
 0x2a3   : > { %v1969_v53 = vpop.eup %1968  ;;  %v1638_v42 = vpack.c.bf16 %v1239_v13, %v1238_v35  ;;  %v1216_v61 = vmul.f32 %v2885_v16, %v1178_v23  ;;  %1982 = vrsqrt.f32 %v1100_v33  ;;  %v1084_v11 = vmul.f32 0.0078125, %v1049_v25 }
 0x2a4   : > { %v1971_v49 = vpop.eup %1970  ;;  %v1255_v45 = vadd.f32 %v2892_v43, %v1217_v2  ;;  %v1161_v54 = vmul.f32 %v1969_v53, %v2821_v3  ;;  %v1117_v40 = vadd.f32 1e-12, %v1085_v12 }
 0x2a5   : > { %1694 = vst [vmem:[%s2904_s23 + $0x28] sm:$0xff] %v1638_v42   ;;  %v1254_v36 = vadd.f32 %v2892_v43, %v1216_v61  ;;  %v1160_v50 = vmul.f32 %v1971_v49, %v2826_v18  ;;  %v1116_v44 = vadd.f32 1e-12, %v1084_v11  ;;  %v1055_v62 = vpop.xlane.xlu1 %1054 }
 0x2a6   : > { %v1199_v58 = vmul.f32 %v2885_v16, %v1161_v54  ;;  %1984 = vrsqrt.f32 %v1117_v40  ;;  %v1053_v24 = vpop.xlane.xlu0 %1052  ;;  %v1087_v32 = vmul.f32 0.0078125, %v1055_v62 }
 0x2a7   : > { %v1973_v41 = vpop.eup %1972  ;;  %v1678_v15 = vpack.c.bf16 %v1255_v45, %v1254_v36  ;;  %v1198_v46 = vmul.f32 %v2885_v16, %v1160_v50  ;;  %1986 = vrsqrt.f32 %v1116_v44  ;;  %v1086_v3 = vmul.f32 0.0078125, %v1053_v24 }
 0x2a8   : > { %v1975_v52 = vpop.eup %1974  ;;  %v1237_v59 = vadd.f32 %v2892_v43, %v1199_v58  ;;  %v1177_v18 = vmul.f32 %v1973_v41, %v2831_v56  ;;  %v1119_v48 = vadd.f32 1e-12, %v1087_v32 }
 0x2a9   : > { %1702 = vst [vmem:[%s2904_s23 + $0x68] sm:$0xff] %v1678_v15   ;;  %v1236_v27 = vadd.f32 %v2892_v43, %v1198_v46  ;;  %v1176_v30 = vmul.f32 %v1975_v52, %v2836_v14  ;;  %v1118_v51 = vadd.f32 1e-12, %v1086_v3 }
 0x2aa   : > { %v1215_v29 = vmul.f32 %v2885_v16, %v1177_v18  ;;  %1988 = vrsqrt.f32 %v1119_v48 }
 0x2ab   : > { %v1977_v1 = vpop.eup %1976  ;;  %v1633_v19 = vpack.c.bf16 %v1237_v59, %v1236_v27  ;;  %v1214_v20 = vmul.f32 %v2885_v16, %v1176_v30  ;;  %1990 = vrsqrt.f32 %v1118_v51 }
 0x2ac   : > { %v1979_v31 = vpop.eup %1978  ;;  %v1253_v0 = vadd.f32 %v2892_v43, %v1215_v29  ;;  %v1167_v56 = vmul.f32 %v1977_v1, %v2841_v28 }
 0x2ad   : > { %1693 = vst [vmem:[%s2904_s23 + $0x20] sm:$0xff] %v1633_v19   ;;  %v1252_v37 = vadd.f32 %v2892_v43, %v1214_v20  ;;  %v1166_v14 = vmul.f32 %v1979_v31, %v2846_v6 }
 0x2ae   : > { %v1205_v5 = vmul.f32 %v2885_v16, %v1167_v56 }
 0x2af   : > { %v1981_v17 = vpop.eup %1980  ;;  %v1673_v9 = vpack.c.bf16 %v1253_v0, %v1252_v37  ;;  %v1204_v7 = vmul.f32 %v2885_v16, %v1166_v14 }
 0x2b0   : > { %v1983_v34 = vpop.eup %1982  ;;  %v1243_v4 = vadd.f32 %v2892_v43, %v1205_v5  ;;  %v1165_v57 = vmul.f32 %v1981_v17, %v2851_v55 }
 0x2b1   : > { %1701 = vst [vmem:[%s2904_s23 + $0x60] sm:$0xff] %v1673_v9   ;;  %v1242_v28 = vadd.f32 %v2892_v43, %v1204_v7  ;;  %v1164_v38 = vmul.f32 %v1983_v34, %v2856_v10 }
 0x2b2   : > { %v1203_v26 = vmul.f32 %v2885_v16, %v1165_v57 }
 0x2b3   : > { %v1985_v6 = vpop.eup %1984  ;;  %v1648_v13 = vpack.c.bf16 %v1243_v4, %v1242_v28  ;;  %v1202_v47 = vmul.f32 %v2885_v16, %v1164_v38 }
 0x2b4   : > { %v1987_v39 = vpop.eup %1986  ;;  %v1241_v35 = vadd.f32 %v2892_v43, %v1203_v26  ;;  %v1181_v23 = vmul.f32 %v1985_v6, %v2861_v22 }
 0x2b5   : > { %1696 = vst [vmem:[%s2904_s23 + $0x38] sm:$0xff] %v1648_v13   ;;  %v1240_v55 = vadd.f32 %v2892_v43, %v1202_v47  ;;  %v1180_v33 = vmul.f32 %v1987_v39, %v2866_v60 }
 0x2b6   : > { %v1219_v10 = vmul.f32 %v2885_v16, %v1181_v23 }
 0x2b7   : > { %v1989_v63 = vpop.eup %1988  ;;  %v1643_v2 = vpack.c.bf16 %v1241_v35, %v1240_v55  ;;  %v1218_v25 = vmul.f32 %v2885_v16, %v1180_v33 }
 0x2b8   : > { %v1991_v12 = vpop.eup %1990  ;;  %v1257_v53 = vadd.f32 %v2892_v43, %v1219_v10  ;;  %v1183_v22 = vmul.f32 %v1989_v63, %v2871_v8 }
 0x2b9   : > { %1695 = vst [vmem:[%s2904_s23 + $0x30] sm:$0xff] %v1643_v2   ;;  %v1256_v42 = vadd.f32 %v2892_v43, %v1218_v25  ;;  %v1182_v61 = vmul.f32 %v1991_v12, %v2876_v21 }
 0x2ba   : > { %v1221_v60 = vmul.f32 %v2885_v16, %v1183_v22 }
 0x2bb   : > { %v1683_v11 = vpack.c.bf16 %v1257_v53, %v1256_v42  ;;  %v1220_v49 = vmul.f32 %v2885_v16, %v1182_v61 }
 0x2bc   : > { %v1259_v45 = vadd.f32 %v2892_v43, %v1221_v60 }
 0x2bd   : > { %1703 = vst [vmem:[%s2904_s23 + $0x70] sm:$0xff] %v1683_v11   ;;  %v1258_v54 = vadd.f32 %v2892_v43, %v1220_v49 }
 0x2bf   : > { %v1688_v8 = vpack.c.bf16 %v1259_v45, %v1258_v54 }
 0x2c1   : > { %1704 = vst [vmem:[%s2904_s23 + $0x78] sm:$0xff] %v1688_v8  }
 0x2c2   : > { %2059 = shalt.err (!%p2056_p0)
}
 0x2c3   : > { %s2060_s29 = scalar_lea.hbm %s3011_s12, 2048  ;;  %s2064_s8 = scalar_lea.hbm %s3061_s5, 8192 }
 0x2c4   : > { %p2061_p5 = scmp.ne.s32.totalorder %s3011_s12, %s2060_s29  ;;  %p2065_p4 = scmp.lt.s32.totalorder %s3011_s12, %s3061_s5 }
 0x2c5   : > { %p2066_p6 = scmp.lt.s32.totalorder %s2064_s8, %s2060_s29 }
 0x2c6   : > { %p2062_p9 = pnand %p2061_p5, %p3077_p10 }
 0x2c7   : > { %p2067_p8 = por %p2066_p6, %p2065_p4 }
 0x2c8   : > { %p2063_p1 = pneg %p2062_p9 }
 0x2ca   : > { %p2068_p3 = pnand %p2067_p8, %p2063_p1 }
 0x2cc   : > { %2071 = shalt.err (!%p2068_p3)
}
 0x2cd   : > { %s2123_s27 = smov 64   ;;  %s2124_s9 = smov 4  }
 0x2ce   : > { %1799 = dma.vmem_to_hbm [thread:$0]  (%p3077_p10), %s3013_s28, 2048, %s3011_s12, %s1421_s16, %s2123_s27, %s2123_s27, %s2124_s9  }
 0x2cf PF: > { %p1816_p7 = scmp.ge.s32.totalorder %s2114_s21, 2  ;;  %s1449_s10 = sand.u32 1, %s2102_s18  }
 0x2d0   : > { %p3078_p11 = scmp.ne.s32.totalorder %s3067_s25, 0  ;;  %s1450_s22 = scalar_lea.sflag [#allocation4], %s1449_s10 }
 0x2d2   : > { %p1810_p12 = pnand %p1816_p7, %p3078_p11 }
 0x2d4   : > { %p1811_p2 = pneg %p1810_p12 }
 0x2d6   : > { %2097 = dma.done.wait (%p1811_p2), %s1450_s22, 2048  }
 0x2d7   : > { %2099 = vsyncadd (%p1811_p2), %s1450_s22, 4294965248  ;;  %p19_p13 = scmp.ge.s32.totalorder %s2208_s30, 6   ;;  %s3079_s18 = smov %s2106_s19 }
 0x2d8   : > { %s3080_s19 = smov %s2110_s20  ;;  %s3081_s20 = smov %s2225_s13 }
 0x2d9   : > { %s3082_s21 = smov %s2208_s30  ;;  %21 = sbr.rel (!%p19_p13) target bundleno = 6 (0x6), region = 89 }
 0x2de   :  { %1455 = vsyncpa [#allocation3], 1 }
 0x2df   :  { %1457 = vsyncpa [#allocation3 + $0x1], 1 }
 0x2e0   :  { %1458 = vsyncpa [#allocation6], 1 }
 0x2e1   :  { %1459 = vsyncpa [#allocation4], 1 }
 0x2e2   :  { %1461 = vsyncpa [#allocation4 + $0x1], 1 }

</bundles_post_ra>
